<compile_context>
chip_gen: v7x
topology: tpu7x:2x2x1
jax: 0.10.0
libtpu: 0.0.40
codegen_flags: <defaults>
</compile_context>

<pallas_src>
import numpy as np
import jax
import jax.numpy as jnp
from jax import lax
from jax.experimental import pallas as pl
from jax.experimental.pallas import tpu as pltpu

# ---------------- problem sizes (small, consistent with the module) ----------
N_CLASSES = 10
CHANNELS = 1
IMG_SIZE = 16
IMG_SHAPE = (CHANNELS, IMG_SIZE, IMG_SIZE)
IMG_FLAT = int(np.prod(IMG_SHAPE))          # 256  (lane-aligned contraction)
D_IN = N_CLASSES + IMG_FLAT                 # 266  (only for PyTorch-shaped params)
HIDDEN = 512
BATCH = 8


def _round_up(x, m):
    return (x + m - 1) // m * m


# ---------------- Pallas kernel: the whole MLP hot path ----------------------
def _disc_kernel(img_ref, lab_ref, emb_ref,
                 w1i_ref, w1e_ref, b1_ref,
                 w2_ref, b2_ref,
                 w3_ref, b3_ref,
                 w4_ref, b4_ref,
                 o_ref):
    f32 = jnp.float32

    def lrelu(v):
        return jnp.where(v >= 0, v, 0.2 * v)

    # ---- label embedding fused in-kernel: one-hot selection via tiny matmul ----
    lab = lab_ref[...]                                                   # (TB, 1) i32
    tb = lab.shape[0]
    cls = lax.broadcasted_iota(jnp.int32, (tb, N_CLASSES), 1)
    onehot = jnp.where(lab == cls, 1.0, 0.0).astype(f32)                 # (TB, nc)

    # (emb_table @ w1_emb)[label] == emb_table[label] @ w1_emb  (exact row select)
    emb_w = jnp.dot(emb_ref[...], w1e_ref[...].astype(f32),
                    preferred_element_type=f32)                          # (nc, 512)

    # ---- layer 1: split contraction (aligned K=256 + tiny K=n_classes) --------
    h = jnp.dot(img_ref[...], w1i_ref[...].astype(f32),
                preferred_element_type=f32)                              # (TB, 512)
    h = h + jnp.dot(onehot, emb_w, preferred_element_type=f32)
    h = lrelu(h + b1_ref[...])

    # ---- layer 2 (Dropout(0.4) -> identity in eval mode) ----------------------
    h = lrelu(jnp.dot(h, w2_ref[...].astype(f32),
                      preferred_element_type=f32) + b2_ref[...])

    # ---- layer 3 (Dropout(0.4) -> identity in eval mode) ----------------------
    h = lrelu(jnp.dot(h, w3_ref[...].astype(f32),
                      preferred_element_type=f32) + b3_ref[...])

    # ---- layer 4 (512 -> 1): VPU multiply + row reduce (skip N=1 MXU matmul) --
    out = jnp.sum(h * w4_ref[...].astype(f32), axis=-1, keepdims=True) + b4_ref[...]
    o_ref[...] = out.astype(o_ref.dtype)                                 # (TB, 1)


def discriminator_forward(img, labels, params, *, batch_tile=128):
    """img: (B, C, H, W) float32, labels: (B,) int32."""
    B = img.shape[0]
    img_flat = img.reshape(B, IMG_FLAT).astype(jnp.float32)              # (B, 256)
    lab2d = labels.astype(jnp.int32).reshape(B, 1)                       # (B, 1)

    # Batch tile: fill the MXU M-dim for large B; keep (8,128) legality for small B.
    TB = batch_tile if B >= batch_tile else _round_up(B, 8)
    Bp = _round_up(B, TB)
    if Bp != B:
        img_flat = jnp.pad(img_flat, ((0, Bp - B), (0, 0)))
        lab2d = jnp.pad(lab2d, ((0, Bp - B), (0, 0)))
    n_tiles = Bp // TB

    # bf16 weights: halves HBM weight traffic (the kernel is DMA-bound);
    # biases / activations / accumulation stay f32.
    bf16 = jnp.bfloat16
    w1i = params["w1"][:IMG_FLAT].astype(bf16)          # (256, 512)
    w1e = params["w1"][IMG_FLAT:].astype(bf16)          # (10, 512)
    w2 = params["w2"].astype(bf16)                      # (512, 512)
    w3 = params["w3"].astype(bf16)                      # (512, 512)
    w4 = params["w4"].reshape(1, HIDDEN).astype(bf16)   # (1, 512) for VPU reduce
    emb = params["emb"].astype(jnp.float32)             # (10, 10) tiny -> keep f32

    operands = (img_flat, lab2d, emb,
                w1i, w1e, params["b1"],
                w2, params["b2"],
                w3, params["b3"],
                w4, params["b4"])

    def batch_spec(shape):
        return pl.BlockSpec((TB,) + shape[1:],
                            lambda i: (i,) + (0,) * (len(shape) - 1))

    def resident_spec(shape):
        # constant block index -> weights/biases stay VMEM-resident across tiles
        return pl.BlockSpec(shape, lambda i: (0,) * len(shape))

    in_specs = [batch_spec(img_flat.shape), batch_spec(lab2d.shape)]
    in_specs += [resident_spec(op.shape) for op in operands[2:]]

    flops = 2 * Bp * (IMG_FLAT * HIDDEN + N_CLASSES * HIDDEN
                      + 2 * HIDDEN * HIDDEN + HIDDEN)
    bytes_accessed = sum(int(np.prod(op.shape)) * op.dtype.itemsize
                         for op in operands) + Bp * 4

    out = pl.pallas_call(
        _disc_kernel,
        out_shape=jax.ShapeDtypeStruct((Bp, 1), jnp.float32),
        grid_spec=pltpu.PrefetchScalarGridSpec(
            num_scalar_prefetch=0,
            grid=(n_tiles,),
            in_specs=in_specs,
            out_specs=pl.BlockSpec((TB, 1), lambda i: (i, 0)),
        ),
        compiler_params=pltpu.CompilerParams(
            dimension_semantics=("parallel",),          # batch tiles across TCs (v7x)
            vmem_limit_bytes=16 * 1024 * 1024,
        ),
        cost_estimate=pl.CostEstimate(
            flops=flops, transcendentals=0, bytes_accessed=bytes_accessed),
    )(*operands)

    return out[:B]


# ---------------- deterministic parameter init (PyTorch-style) ---------------
def init_params(key):
    ks = jax.random.split(key, 9)

    def linear(kw, kb, fan_in, fan_out):
        bound = 1.0 / np.sqrt(fan_in)
        w = jax.random.uniform(kw, (fan_in, fan_out), jnp.float32, -bound, bound)
        b = jax.random.uniform(kb, (1, fan_out), jnp.float32, -bound, bound)
        return w, b

    emb = jax.random.normal(ks[0], (N_CLASSES, N_CLASSES), jnp.float32)
    w1, b1 = linear(ks[1], ks[2], D_IN, HIDDEN)
    w2, b2 = linear(ks[3], ks[4], HIDDEN, HIDDEN)
    w3, b3 = linear(ks[5], ks[6], HIDDEN, HIDDEN)
    w4, b4 = linear(ks[7], ks[8], HIDDEN, 1)
    return dict(emb=emb, w1=w1, b1=b1, w2=w2, b2=b2, w3=w3, b3=b3, w4=w4, b4=b4)


def _reference(img, labels, p):
    """Pure-JAX reference with the same bf16 weight quantization as the kernel."""
    q = lambda w: w.astype(jnp.bfloat16).astype(jnp.float32)
    B = img.shape[0]
    d_in = jnp.concatenate([img.reshape(B, -1), p["emb"][labels]], axis=-1)
    lrelu = lambda v: jnp.where(v >= 0, v, 0.2 * v)
    h = lrelu(d_in @ q(p["w1"]) + p["b1"])
    h = lrelu(h @ q(p["w2"]) + p["b2"])       # Dropout -> identity (eval)
    h = lrelu(h @ q(p["w3"]) + p["b3"])       # Dropout -> identity (eval)
    return h @ q(p["w4"]) + p["b4"]


if __name__ == "__main__":
    key = jax.random.PRNGKey(0)
    k_img, k_lab, k_par = jax.random.split(key, 3)

    img = jax.random.normal(k_img, (BATCH, *IMG_SHAPE), jnp.float32)   # NCHW
    labels = jax.random.randint(k_lab, (BATCH,), 0, N_CLASSES, jnp.int32)
    params = init_params(k_par)

    out = jax.block_until_ready(discriminator_forward(img, labels, params))

    ref = _reference(img, labels, params)
    np.testing.assert_allclose(np.asarray(out), np.asarray(ref), rtol=5e-3, atol=5e-3)
    assert out.shape == (BATCH, 1)

    print("KERNEL_OK")
</pallas_src>

<mosaic_0001>
module attributes {stable_mosaic.version = 11 : i64} {
  func.func @_disc_kernel(%arg0: i32, %arg1: memref<8x256xf32, #tpu.memory_space<vmem>>, %arg2: memref<8x1xi32, #tpu.memory_space<vmem>>, %arg3: memref<10x10xf32, #tpu.memory_space<vmem>>, %arg4: memref<256x512xbf16, #tpu.memory_space<vmem>>, %arg5: memref<10x512xbf16, #tpu.memory_space<vmem>>, %arg6: memref<1x512xf32, #tpu.memory_space<vmem>>, %arg7: memref<512x512xbf16, #tpu.memory_space<vmem>>, %arg8: memref<1x512xf32, #tpu.memory_space<vmem>>, %arg9: memref<512x512xbf16, #tpu.memory_space<vmem>>, %arg10: memref<1x512xf32, #tpu.memory_space<vmem>>, %arg11: memref<1x512xbf16, #tpu.memory_space<vmem>>, %arg12: memref<1x1xf32, #tpu.memory_space<vmem>>, %arg13: memref<8x1xf32, #tpu.memory_space<vmem>>) attributes {dimension_semantics = [#tpu.dimension_semantics<parallel>], iteration_bounds = array<i64: 1>, scalar_prefetch = 0 : i64, scratch_operands = 0 : i64, tpu.core_type = #tpu.core_type<tc>, window_params = [{transform_indices = @transform_0, window_bounds = array<i64: 8, 256>}, {transform_indices = @transform_1, window_bounds = array<i64: 8, 1>}, {pipeline_mode = #tpu.pipeline_mode<synchronous>, transform_indices = @transform_2, window_bounds = array<i64: 10, 10>}, {pipeline_mode = #tpu.pipeline_mode<synchronous>, transform_indices = @transform_3, window_bounds = array<i64: 256, 512>}, {pipeline_mode = #tpu.pipeline_mode<synchronous>, transform_indices = @transform_4, window_bounds = array<i64: 10, 512>}, {pipeline_mode = #tpu.pipeline_mode<synchronous>, transform_indices = @transform_5, window_bounds = array<i64: 1, 512>}, {pipeline_mode = #tpu.pipeline_mode<synchronous>, transform_indices = @transform_6, window_bounds = array<i64: 512, 512>}, {pipeline_mode = #tpu.pipeline_mode<synchronous>, transform_indices = @transform_7, window_bounds = array<i64: 1, 512>}, {pipeline_mode = #tpu.pipeline_mode<synchronous>, transform_indices = @transform_8, window_bounds = array<i64: 512, 512>}, {pipeline_mode = #tpu.pipeline_mode<synchronous>, transform_indices = @transform_9, window_bounds = array<i64: 1, 512>}, {pipeline_mode = #tpu.pipeline_mode<synchronous>, transform_indices = @transform_10, window_bounds = array<i64: 1, 512>}, {pipeline_mode = #tpu.pipeline_mode<synchronous>, transform_indices = @transform_11, window_bounds = array<i64: 1, 1>}, {transform_indices = @transform_12, window_bounds = array<i64: 8, 1>}]} {
    %c0 = arith.constant 0 : index
    %c0_0 = arith.constant 0 : index
    %0 = vector.load %arg2[%c0, %c0_0] : memref<8x1xi32, #tpu.memory_space<vmem>>, vector<8x1xi32>
    %1 = tpu.iota {dimensions = array<i32: 1>} : vector<8x10xi32>
    %2 = vector.broadcast %0 : vector<8x1xi32> to vector<8x10xi32>
    %3 = arith.cmpi eq, %2, %1 : vector<8x10xi32>
    %cst = arith.constant 1.000000e+00 : f32
    %cst_1 = arith.constant 0.000000e+00 : f32
    %4 = vector.broadcast %cst : f32 to vector<8x10xf32>
    %5 = vector.broadcast %cst_1 : f32 to vector<8x10xf32>
    %6 = arith.select %3, %4, %5 : vector<8x10xi1>, vector<8x10xf32>
    %c0_2 = arith.constant 0 : index
    %c0_3 = arith.constant 0 : index
    %7 = vector.load %arg3[%c0_2, %c0_3] : memref<10x10xf32, #tpu.memory_space<vmem>>, vector<10x10xf32>
    %c0_4 = arith.constant 0 : index
    %c0_5 = arith.constant 0 : index
    %8 = vector.load %arg5[%c0_4, %c0_5] : memref<10x512xbf16, #tpu.memory_space<vmem>>, vector<10x512xbf16>
    %9 = arith.extf %8 : vector<10x512xbf16> to vector<10x512xf32>
    %cst_6 = arith.constant dense<0.000000e+00> : vector<10x512xf32>
    %10 = tpu.matmul %7, %9, %cst_6 {dimension_numbers = #tpu.dot_dimension_numbers<[1], [0], [0], [1], [0, 0, 1, 1], [], []>} : vector<10x10xf32>, vector<10x512xf32>, vector<10x512xf32> -> vector<10x512xf32>
    %c0_7 = arith.constant 0 : index
    %c0_8 = arith.constant 0 : index
    %11 = vector.load %arg1[%c0_7, %c0_8] : memref<8x256xf32, #tpu.memory_space<vmem>>, vector<8x256xf32>
    %c0_9 = arith.constant 0 : index
    %c0_10 = arith.constant 0 : index
    %12 = vector.load %arg4[%c0_9, %c0_10] : memref<256x512xbf16, #tpu.memory_space<vmem>>, vector<256x512xbf16>
    %13 = arith.extf %12 : vector<256x512xbf16> to vector<256x512xf32>
    %cst_11 = arith.constant dense<0.000000e+00> : vector<8x512xf32>
    %14 = tpu.matmul %11, %13, %cst_11 {dimension_numbers = #tpu.dot_dimension_numbers<[1], [0], [0], [1], [0, 0, 1, 1], [], []>} : vector<8x256xf32>, vector<256x512xf32>, vector<8x512xf32> -> vector<8x512xf32>
    %cst_12 = arith.constant dense<0.000000e+00> : vector<8x512xf32>
    %15 = tpu.matmul %6, %10, %cst_12 {dimension_numbers = #tpu.dot_dimension_numbers<[1], [0], [0], [1], [0, 0, 1, 1], [], []>} : vector<8x10xf32>, vector<10x512xf32>, vector<8x512xf32> -> vector<8x512xf32>
    %16 = arith.addf %14, %15 : vector<8x512xf32>
    %c0_13 = arith.constant 0 : index
    %c0_14 = arith.constant 0 : index
    %17 = vector.load %arg6[%c0_13, %c0_14] : memref<1x512xf32, #tpu.memory_space<vmem>>, vector<1x512xf32>
    %18 = vector.broadcast %17 : vector<1x512xf32> to vector<8x512xf32>
    %19 = arith.addf %16, %18 : vector<8x512xf32>
    %cst_15 = arith.constant 0.000000e+00 : f32
    %20 = vector.broadcast %cst_15 : f32 to vector<8x512xf32>
    %21 = arith.cmpf oge, %19, %20 : vector<8x512xf32>
    %cst_16 = arith.constant 2.000000e-01 : f32
    %22 = vector.broadcast %cst_16 : f32 to vector<8x512xf32>
    %23 = arith.mulf %22, %19 : vector<8x512xf32>
    %24 = arith.select %21, %19, %23 : vector<8x512xi1>, vector<8x512xf32>
    %c0_17 = arith.constant 0 : index
    %c0_18 = arith.constant 0 : index
    %25 = vector.load %arg7[%c0_17, %c0_18] : memref<512x512xbf16, #tpu.memory_space<vmem>>, vector<512x512xbf16>
    %26 = arith.extf %25 : vector<512x512xbf16> to vector<512x512xf32>
    %cst_19 = arith.constant dense<0.000000e+00> : vector<8x512xf32>
    %27 = tpu.matmul %24, %26, %cst_19 {dimension_numbers = #tpu.dot_dimension_numbers<[1], [0], [0], [1], [0, 0, 1, 1], [], []>} : vector<8x512xf32>, vector<512x512xf32>, vector<8x512xf32> -> vector<8x512xf32>
    %c0_20 = arith.constant 0 : index
    %c0_21 = arith.constant 0 : index
    %28 = vector.load %arg8[%c0_20, %c0_21] : memref<1x512xf32, #tpu.memory_space<vmem>>, vector<1x512xf32>
    %29 = vector.broadcast %28 : vector<1x512xf32> to vector<8x512xf32>
    %30 = arith.addf %27, %29 : vector<8x512xf32>
    %cst_22 = arith.constant 0.000000e+00 : f32
    %31 = vector.broadcast %cst_22 : f32 to vector<8x512xf32>
    %32 = arith.cmpf oge, %30, %31 : vector<8x512xf32>
    %cst_23 = arith.constant 2.000000e-01 : f32
    %33 = vector.broadcast %cst_23 : f32 to vector<8x512xf32>
    %34 = arith.mulf %33, %30 : vector<8x512xf32>
    %35 = arith.select %32, %30, %34 : vector<8x512xi1>, vector<8x512xf32>
    %c0_24 = arith.constant 0 : index
    %c0_25 = arith.constant 0 : index
    %36 = vector.load %arg9[%c0_24, %c0_25] : memref<512x512xbf16, #tpu.memory_space<vmem>>, vector<512x512xbf16>
    %37 = arith.extf %36 : vector<512x512xbf16> to vector<512x512xf32>
    %cst_26 = arith.constant dense<0.000000e+00> : vector<8x512xf32>
    %38 = tpu.matmul %35, %37, %cst_26 {dimension_numbers = #tpu.dot_dimension_numbers<[1], [0], [0], [1], [0, 0, 1, 1], [], []>} : vector<8x512xf32>, vector<512x512xf32>, vector<8x512xf32> -> vector<8x512xf32>
    %c0_27 = arith.constant 0 : index
    %c0_28 = arith.constant 0 : index
    %39 = vector.load %arg10[%c0_27, %c0_28] : memref<1x512xf32, #tpu.memory_space<vmem>>, vector<1x512xf32>
    %40 = vector.broadcast %39 : vector<1x512xf32> to vector<8x512xf32>
    %41 = arith.addf %38, %40 : vector<8x512xf32>
    %cst_29 = arith.constant 0.000000e+00 : f32
    %42 = vector.broadcast %cst_29 : f32 to vector<8x512xf32>
    %43 = arith.cmpf oge, %41, %42 : vector<8x512xf32>
    %cst_30 = arith.constant 2.000000e-01 : f32
    %44 = vector.broadcast %cst_30 : f32 to vector<8x512xf32>
    %45 = arith.mulf %44, %41 : vector<8x512xf32>
    %46 = arith.select %43, %41, %45 : vector<8x512xi1>, vector<8x512xf32>
    %c0_31 = arith.constant 0 : index
    %c0_32 = arith.constant 0 : index
    %47 = vector.load %arg11[%c0_31, %c0_32] : memref<1x512xbf16, #tpu.memory_space<vmem>>, vector<1x512xbf16>
    %48 = arith.extf %47 : vector<1x512xbf16> to vector<1x512xf32>
    %49 = vector.broadcast %48 : vector<1x512xf32> to vector<8x512xf32>
    %50 = arith.mulf %46, %49 : vector<8x512xf32>
    %cst_33 = arith.constant dense<0.000000e+00> : vector<8xf32>
    %51 = vector.multi_reduction <add>, %50, %cst_33 [1] : vector<8x512xf32> to vector<8xf32>
    %52 = vector.shape_cast %51 : vector<8xf32> to vector<8x1xf32>
    %c0_34 = arith.constant 0 : index
    %c0_35 = arith.constant 0 : index
    %53 = vector.load %arg12[%c0_34, %c0_35] : memref<1x1xf32, #tpu.memory_space<vmem>>, vector<1x1xf32>
    %54 = vector.broadcast %53 : vector<1x1xf32> to vector<8x1xf32>
    %55 = arith.addf %52, %54 : vector<8x1xf32>
    %c0_36 = arith.constant 0 : index
    %c0_37 = arith.constant 0 : index
    %56 = vector.load %arg13[%c0_36, %c0_37] : memref<8x1xf32, #tpu.memory_space<vmem>>, vector<8x1xf32>
    tpu.vector_store %arg13[%c0_36, %c0_37], %55 {strides = array<i32>} : memref<8x1xf32, #tpu.memory_space<vmem>>, vector<8x1xf32>,
    return
  }
  func.func @transform_0(%arg0: i32) -> (i32, i32) {
    %c0_i32 = arith.constant 0 : i32
    %c0_i32_0 = arith.constant 0 : i32
    return %arg0, %c0_i32 : i32, i32
  }
  func.func @transform_1(%arg0: i32) -> (i32, i32) {
    %c0_i32 = arith.constant 0 : i32
    %c0_i32_0 = arith.constant 0 : i32
    return %arg0, %c0_i32 : i32, i32
  }
  func.func @transform_2(%arg0: i32) -> (i32, i32) {
    %c0_i32 = arith.constant 0 : i32
    %c0_i32_0 = arith.constant 0 : i32
    %c0_i32_1 = arith.constant 0 : i32
    return %c0_i32, %c0_i32_0 : i32, i32
  }
  func.func @transform_3(%arg0: i32) -> (i32, i32) {
    %c0_i32 = arith.constant 0 : i32
    %c0_i32_0 = arith.constant 0 : i32
    %c0_i32_1 = arith.constant 0 : i32
    return %c0_i32, %c0_i32_0 : i32, i32
  }
  func.func @transform_4(%arg0: i32) -> (i32, i32) {
    %c0_i32 = arith.constant 0 : i32
    %c0_i32_0 = arith.constant 0 : i32
    %c0_i32_1 = arith.constant 0 : i32
    return %c0_i32, %c0_i32_0 : i32, i32
  }
  func.func @transform_5(%arg0: i32) -> (i32, i32) {
    %c0_i32 = arith.constant 0 : i32
    %c0_i32_0 = arith.constant 0 : i32
    %c0_i32_1 = arith.constant 0 : i32
    return %c0_i32, %c0_i32_0 : i32, i32
  }
  func.func @transform_6(%arg0: i32) -> (i32, i32) {
    %c0_i32 = arith.constant 0 : i32
    %c0_i32_0 = arith.constant 0 : i32
    %c0_i32_1 = arith.constant 0 : i32
    return %c0_i32, %c0_i32_0 : i32, i32
  }
  func.func @transform_7(%arg0: i32) -> (i32, i32) {
    %c0_i32 = arith.constant 0 : i32
    %c0_i32_0 = arith.constant 0 : i32
    %c0_i32_1 = arith.constant 0 : i32
    return %c0_i32, %c0_i32_0 : i32, i32
  }
  func.func @transform_8(%arg0: i32) -> (i32, i32) {
    %c0_i32 = arith.constant 0 : i32
    %c0_i32_0 = arith.constant 0 : i32
    %c0_i32_1 = arith.constant 0 : i32
    return %c0_i32, %c0_i32_0 : i32, i32
  }
  func.func @transform_9(%arg0: i32) -> (i32, i32) {
    %c0_i32 = arith.constant 0 : i32
    %c0_i32_0 = arith.constant 0 : i32
    %c0_i32_1 = arith.constant 0 : i32
    return %c0_i32, %c0_i32_0 : i32, i32
  }
  func.func @transform_10(%arg0: i32) -> (i32, i32) {
    %c0_i32 = arith.constant 0 : i32
    %c0_i32_0 = arith.constant 0 : i32
    %c0_i32_1 = arith.constant 0 : i32
    return %c0_i32, %c0_i32_0 : i32, i32
  }
  func.func @transform_11(%arg0: i32) -> (i32, i32) {
    %c0_i32 = arith.constant 0 : i32
    %c0_i32_0 = arith.constant 0 : i32
    %c0_i32_1 = arith.constant 0 : i32
    return %c0_i32, %c0_i32_0 : i32, i32
  }
  func.func @transform_12(%arg0: i32) -> (i32, i32) {
    %c0_i32 = arith.constant 0 : i32
    %c0_i32_0 = arith.constant 0 : i32
    return %arg0, %c0_i32 : i32, i32
  }
}

</mosaic_0001>

<bundles_post_ra>
// kernel: tpu_custom_call.1
= control target key start
LH: loop header
LB: loop body
LE: loop exit
PB: predicated region body
PF: predicated region fallthrough
CT: control target
= control target key end

     0   :  { %s4191_s0 = inlined_call_operand.hbm [shape: f32[8,256], index: 0, kind: input, shape index: {}]   ;;  %s4192_s1 = inlined_call_operand.vmem [shape: s32[8,1], index: 1, kind: input, shape index: {}]   ;;  %s4193_s2 = inlined_call_operand.vmem [shape: f32[10,10], index: 2, kind: input, shape index: {}]   ;;  %s4194_s3 = inlined_call_operand.hbm [shape: bf16[256,512], index: 3, kind: input, shape index: {}]   ;;  %s4195_s4 = inlined_call_operand.hbm [shape: bf16[10,512], index: 4, kind: input, shape index: {}]   ;;  %s4196_s5 = inlined_call_operand.vmem [shape: f32[1,512], index: 5, kind: input, shape index: {}]   ;;  %s4197_s6 = inlined_call_operand.hbm [shape: bf16[512,512], index: 6, kind: input, shape index: {}]   ;;  %s4198_s7 = inlined_call_operand.vmem [shape: f32[1,512], index: 7, kind: input, shape index: {}]   ;;  %s4199_s8 = inlined_call_operand.hbm [shape: bf16[512,512], index: 8, kind: input, shape index: {}]   ;;  %s4200_s9 = inlined_call_operand.vmem [shape: f32[1,512], index: 9, kind: input, shape index: {}]   ;;  %s4201_s10 = inlined_call_operand.vmem [shape: bf16[1,512], index: 10, kind: input, shape index: {}]   ;;  %s4202_s11 = inlined_call_operand.<no memory space> [shape: f32[1,1], index: 11, kind: input, shape index: {}]   ;;  %s4203_s12 = inlined_call_operand.vmem [shape: f32[8,1], index: 12, kind: output, shape index: {}]  }
   0x1   :  { %v17_v0 = vstv %s4202_s11 }
   0x2   :  { %18 = vst [vmem:[#allocation2] sm:$0x1] %v17_v0 }
   0x3   :  { %19 = vsyncpa [#allocation4], 0 }
   0x4   :  { %20 = vsyncpa [#allocation6], 0 }
   0x5   :  { %21 = vsyncpa [#allocation9], 0  ;;  %s3941_s23 = smov [#allocation5]   ;;  %s3825_s27 = scalar_lea.hbm %s4194_s3, 8192 }
   0x6   :  { %s41_s24 = sshll.u32 %s3941_s23, 4  ;;  %p3826_p0 = scmp.ne.s32.totalorder %s4194_s3, %s3825_s27  ;;  %s42_s24 = int_to_ptr.vmem [resolvable:$true] %s41_s24 }
   0x7   :  { %p3829_p1 = scmp.lt.u32.totalorder %s3825_s27, %s4194_s3 }
   0x9   :  { %p3831_p2 = pnand %p3829_p1, %p3826_p0 }
   0xb   :  { %3834 = shalt.err (!%p3831_p2)
}
   0xc   :  { %s3835_s11 = scalar_lea.vmem %s42_s24, 8192  ;;  %p3840_p4 = scmp.lt.s32.totalorder %s42_s24, %s42_s24 }
   0xd   :  { %p3836_p3 = scmp.ne.s32.totalorder %s42_s24, %s3835_s11  ;;  %p3841_p5 = scmp.lt.s32.totalorder %s3835_s11, %s3835_s11 }
   0xf   :  { %p3842_p6 = por %p3841_p5, %p3840_p4 }
  0x11   :  { %p3843_p7 = pnand %p3842_p6, %p3836_p3 }
  0x13   :  { %3846 = shalt.err (!%p3843_p7)
}
  0x14   :  { %s3942_s14 = smov 256   ;;  %s3943_s15 = smov 16  }
  0x15   :  { %47 = dma.hbm_to_vmem [thread:$0]  %s4194_s3, 8192, %s42_s24, [#allocation6], %s3942_s14, %s3942_s14, %s3943_s15  }
  0x16   :  { %s3944_s18 = smov [#allocation8]   ;;  %s3945_s20 = smov [#allocation3]  }
  0x17   :  { %s67_s19 = sshll.u32 %s3944_s18, 4  ;;  %s28_s21 = sshll.u32 %s3945_s20, 4  ;;  %s68_s19 = int_to_ptr.vmem [resolvable:$true] %s67_s19  ;;  %s29_s21 = int_to_ptr.vmem [resolvable:$true] %s28_s21 }
  0x18   :  { %s3847_s25 = scalar_lea.hbm %s4197_s6, 16384 }
  0x19   :  { %p3848_p8 = scmp.ne.s32.totalorder %s4197_s6, %s3847_s25  ;;  %p3851_p9 = scmp.lt.u32.totalorder %s3847_s25, %s4197_s6 }
  0x1b   :  { %p3853_p10 = pnand %p3851_p9, %p3848_p8 }
  0x1d   :  { %3856 = shalt.err (!%p3853_p10)
}
  0x1e   :  { %s3857_s3 = scalar_lea.vmem %s68_s19, 16384  ;;  %p3862_p12 = scmp.lt.s32.totalorder %s68_s19, %s68_s19 }
  0x1f   :  { %p3858_p11 = scmp.ne.s32.totalorder %s68_s19, %s3857_s3  ;;  %p3863_p13 = scmp.lt.s32.totalorder %s3857_s3, %s3857_s3 }
  0x21   :  { %p3864_p0 = por %p3863_p13, %p3862_p12 }
  0x23   :  { %p3865_p1 = pnand %p3864_p0, %p3858_p11 }
  0x25   :  { %3868 = shalt.err (!%p3865_p1)
}
  0x26   :  { %73 = dma.hbm_to_vmem [thread:$0]  %s4197_s6, 16384, %s68_s19, [#allocation9], %s3942_s14, %s3942_s14, %s3943_s15  }
  0x27   :  { %s3869_s16 = scalar_lea.hbm %s4191_s0, 256 }
  0x28   :  { %p3870_p2 = scmp.ne.s32.totalorder %s4191_s0, %s3869_s16  ;;  %p3873_p3 = scmp.lt.u32.totalorder %s3869_s16, %s4191_s0 }
  0x2a   :  { %p3875_p4 = pnand %p3873_p3, %p3870_p2 }
  0x2c   :  { %3878 = shalt.err (!%p3875_p4)
}
  0x2d   :  { %s3879_s23 = scalar_lea.vmem %s29_s21, 256  ;;  %p3884_p6 = scmp.lt.s32.totalorder %s29_s21, %s29_s21 }
  0x2e   :  { %p3880_p5 = scmp.ne.s32.totalorder %s29_s21, %s3879_s23  ;;  %p3885_p7 = scmp.lt.s32.totalorder %s3879_s23, %s3879_s23 }
  0x30   :  { %p3886_p8 = por %p3885_p7, %p3884_p6 }
  0x32   :  { %p3887_p9 = pnand %p3886_p8, %p3880_p5 }
  0x34   :  { %3890 = shalt.err (!%p3887_p9)
}
  0x35   :  { %31 = dma.hbm_to_vmem [thread:$0]  %s4191_s0, 256, %s29_s21, [#allocation4]  }
  0x36   :  { %s3946_s25 = smov [#allocation7]   ;;  %s3947_s27 = smov [#allocation10]  }
  0x37   :  { %s53_s26 = sshll.u32 %s3946_s25, 4  ;;  %s81_s28 = sshll.u32 %s3947_s27, 4  ;;  %s54_s26 = int_to_ptr.vmem [resolvable:$true] %s53_s26  ;;  %s82_s28 = int_to_ptr.vmem [resolvable:$true] %s81_s28 }
  0x38   :  { %s3891_s24 = scalar_lea.hbm %s4195_s4, 512 }
  0x39   :  { %p3892_p10 = scmp.ne.s32.totalorder %s4195_s4, %s3891_s24  ;;  %p3895_p11 = scmp.lt.u32.totalorder %s3891_s24, %s4195_s4 }
  0x3b   :  { %p3897_p12 = pnand %p3895_p11, %p3892_p10 }
  0x3d   :  { %3900 = shalt.err (!%p3897_p12)
}
  0x3e   :  { %s3901_s0 = scalar_lea.vmem %s54_s26, 512  ;;  %p3906_p0 = scmp.lt.s32.totalorder %s54_s26, %s54_s26 }
  0x3f   :  { %p3902_p13 = scmp.ne.s32.totalorder %s54_s26, %s3901_s0  ;;  %p3907_p1 = scmp.lt.s32.totalorder %s3901_s0, %s3901_s0 }
  0x41   :  { %p3908_p2 = por %p3907_p1, %p3906_p0 }
  0x43   :  { %p3909_p3 = pnand %p3908_p2, %p3902_p13 }
  0x45   :  { %3912 = shalt.err (!%p3909_p3)
}
  0x46   :  { %59 = dma.hbm_to_vmem [thread:$0]  %s4195_s4, 512, %s54_s26, [#allocation6], %s3942_s14, %s3942_s14, %s3943_s15  }
  0x47   :  { %s3913_s22 = scalar_lea.hbm %s4199_s8, 16384 }
  0x48   :  { %p3914_p4 = scmp.ne.s32.totalorder %s4199_s8, %s3913_s22  ;;  %p3917_p5 = scmp.lt.u32.totalorder %s3913_s22, %s4199_s8 }
  0x4a   :  { %p3919_p6 = pnand %p3917_p5, %p3914_p4 }
  0x4c   :  { %3922 = shalt.err (!%p3919_p6)
}
  0x4d   :  { %s3923_s27 = scalar_lea.vmem %s82_s28, 16384  ;;  %p3928_p8 = scmp.lt.s32.totalorder %s82_s28, %s82_s28 }
  0x4e   :  { %p3924_p7 = scmp.ne.s32.totalorder %s82_s28, %s3923_s27  ;;  %p3929_p9 = scmp.lt.s32.totalorder %s3923_s27, %s3923_s27 }
  0x50   :  { %p3930_p10 = por %p3929_p9, %p3928_p8 }
  0x52   :  { %p3931_p11 = pnand %p3930_p10, %p3924_p7 }
  0x54   :  { %3934 = shalt.err (!%p3931_p11)
}
  0x55   :  { %87 = dma.hbm_to_vmem [thread:$0]  %s4199_s8, 16384, %s82_s28, [#allocation9], %s3942_s14, %s3942_s14, %s3943_s15  }
  0x56   :  { %3935 = dma.done.wait [#allocation4], 256  }
  0x57   :  { %3936 = vsyncadd [#allocation4], 4294967040 }
  0x58   :  { %3937 = dma.done.wait [#allocation6], 8704  }
  0x59   :  { %3938 = vsyncadd [#allocation6], 4294958592 }
  0x5a   :  { %3939 = dma.done.wait [#allocation9], 32768  }
  0x5b   :  { %3940 = vsyncadd [#allocation9], 4294934528  ;;  %v3948_v1 = vmov 0.0   ;;  %v3949_v2 = vmov 0   ;;  %vm138_vm0 = vcmask 1041408   ;;  %vm3950_vm1 = vmmov 1  }
  0x5c   :  { %215 = vmatprep.mubr.f32.mxu0 %v3948_v1  ;;  %292 = vmatprep.mubr.f32.mxu1 %v3948_v1  ;;  %vm4091_vm2 = vmpackc.low %vm138_vm0, %vm3950_vm1  ;;  %v3339_v4 = vld [vmem:[#allocation7 + $0x4] ss:$16 sps:$4 sm:$0x1f]   ;;  %v3341_v5 = vld [vmem:[#allocation7] ss:$16 sps:$4 sm:$0x1f]   ;;  %v110_v11 = vlaneseq }
  0x5d   :  { %3338 = vset.pattern.permute.xlu0 %v3949_v2  ;;  %2322 = vmatprep.subr.msk.bf16.mxu0 %vm4091_vm2, %v3339_v4  ;;  %v3342_v6 = vld [vmem:[#allocation7 + $0xc] ss:$16 sps:$4 sm:$0x1f]   ;;  %v3344_v7 = vld [vmem:[#allocation7 + $0x8] ss:$16 sps:$4 sm:$0x1f]  }
  0x5e   :  { %2325 = vmatpush1.bf16.msk.msra.mxu0 %vm4091_vm2, %v3341_v5  ;;  %v117_v8 = vld [vmem:[%s4193_s2] sm:$0xff]  ;;  %vm131_vm3 = vcmask 80896   ;;  %2328 = vmatprep.subr.msk.bf16.mxu1 %vm4091_vm2, %v3342_v6  ;;  %v118_v10 = vld [vmem:[%s4193_s2 + $0x8] sm:$0x3]  ;;  %v111_v15 = vand.u32 127, %v110_v11  ;;  %vm2296_vm1 = vcmask 7168  }
  0x5f   :  { %v109_v9 = vld [vmem:[%s4192_s1] sm:$0xff]  ;;  %2331 = vmatpush1.bf16.msk.msra.mxu1 %vm4091_vm2, %v3344_v7  ;;  %v306_v31 = vld [vmem:[#allocation3 + $0x8] sm:$0xff] }
  0x60   :  { %113 = vperm.xlu0 %3338, %v109_v9   ;;  %v3345_v23 = vld [vmem:[#allocation5 + $0x4] ss:$16 sps:$4 sm:$0xff]   ;;  %v3348_v27 = vld [vmem:[#allocation5 + $0xc] ss:$16 sps:$4 sm:$0xff]   ;;  %v3347_v29 = vld [vmem:[#allocation5] ss:$16 sps:$4 sm:$0xff]  }
  0x61   :  { %2307 = vmatmul.mubr.msk.f32.vlgmr.msra.gmra.mrb[0].mxu0 %vm131_vm3, %v117_v8  ;;  %v3351_v30 = vld [vmem:[#allocation5 + $0x24] ss:$16 sps:$4 sm:$0xff]   ;;  %v3350_v32 = vld [vmem:[#allocation5 + $0x8] ss:$16 sps:$4 sm:$0xff]   ;;  %v3354_v33 = vld [vmem:[#allocation5 + $0x2c] ss:$16 sps:$4 sm:$0xff]  }
  0x62   :  { %221 = vmatprep.mubr.f32.mxu0 %v3948_v1  ;;  %2311 = vmatmul.mubr.msk.f32.vlgmr.msra.gmra.mrb[0].mxu1 %vm131_vm3, %v117_v8  ;;  %v3353_v34 = vld [vmem:[#allocation5 + $0x20] ss:$16 sps:$4 sm:$0xff]   ;;  %v3357_v35 = vld [vmem:[#allocation5 + $0x44] ss:$16 sps:$4 sm:$0xff]   ;;  %v3356_v36 = vld [vmem:[#allocation5 + $0x28] ss:$16 sps:$4 sm:$0xff]  }
  0x63   :  { %298 = vmatprep.mubr.f32.mxu1 %v3948_v1  ;;  %v3360_v37 = vld [vmem:[#allocation5 + $0x4c] ss:$16 sps:$4 sm:$0xff]   ;;  %v3359_v38 = vld [vmem:[#allocation5 + $0x40] ss:$16 sps:$4 sm:$0xff]   ;;  %v3363_v39 = vld [vmem:[#allocation5 + $0x64] ss:$16 sps:$4 sm:$0xff]  }
  0x64   :  { %v3362_v40 = vld [vmem:[#allocation5 + $0x48] ss:$16 sps:$4 sm:$0xff]   ;;  %v3366_v41 = vld [vmem:[#allocation5 + $0x6c] ss:$16 sps:$4 sm:$0xff]   ;;  %v3365_v42 = vld [vmem:[#allocation5 + $0x60] ss:$16 sps:$4 sm:$0xff]  }
  0x65   :  { %2308 = vmatmul.mubr.msk.f32.gmra.mrb[2].mxu0 %vm131_vm3, %v118_v10  ;;  %v3369_v43 = vld [vmem:[#allocation5 + $0x84] ss:$16 sps:$4 sm:$0xff]   ;;  %v3368_v44 = vld [vmem:[#allocation5 + $0x68] ss:$16 sps:$4 sm:$0xff]   ;;  %v3372_v45 = vld [vmem:[#allocation5 + $0x8c] ss:$16 sps:$4 sm:$0xff]  }
  0x66   :  { %578 = vmatprep.mubr.f32.mxu0 %v3948_v1  ;;  %2312 = vmatmul.mubr.msk.f32.gmra.mrb[2].mxu1 %vm131_vm3, %v118_v10  ;;  %v3371_v46 = vld [vmem:[#allocation5 + $0x80] ss:$16 sps:$4 sm:$0xff]   ;;  %v3375_v47 = vld [vmem:[#allocation5 + $0xa4] ss:$16 sps:$4 sm:$0xff]   ;;  %v3374_v48 = vld [vmem:[#allocation5 + $0x88] ss:$16 sps:$4 sm:$0xff]  }
  0x67   :  { %649 = vmatprep.mubr.f32.mxu1 %v3948_v1  ;;  %v3378_v49 = vld [vmem:[#allocation5 + $0xac] ss:$16 sps:$4 sm:$0xff]   ;;  %v3377_v50 = vld [vmem:[#allocation5 + $0xa0] ss:$16 sps:$4 sm:$0xff]   ;;  %v3381_v51 = vld [vmem:[#allocation5 + $0xc4] ss:$16 sps:$4 sm:$0xff]  }
  0x68   :  { %v3380_v52 = vld [vmem:[#allocation5 + $0xa8] ss:$16 sps:$4 sm:$0xff]   ;;  %v3384_v53 = vld [vmem:[#allocation5 + $0xcc] ss:$16 sps:$4 sm:$0xff]   ;;  %v3383_v54 = vld [vmem:[#allocation5 + $0xc0] ss:$16 sps:$4 sm:$0xff]  }
  0x69   :  { %v3387_v55 = vld [vmem:[#allocation5 + $0xe4] ss:$16 sps:$4 sm:$0xff]   ;;  %v3386_v56 = vld [vmem:[#allocation5 + $0xc8] ss:$16 sps:$4 sm:$0xff]   ;;  %v3390_v57 = vld [vmem:[#allocation5 + $0xec] ss:$16 sps:$4 sm:$0xff]  }
  0x6a   :  { %v3389_v58 = vld [vmem:[#allocation5 + $0xe0] ss:$16 sps:$4 sm:$0xff]   ;;  %v3393_v59 = vld [vmem:[#allocation5 + $0x104] ss:$16 sps:$4 sm:$0xff]   ;;  %v3392_v60 = vld [vmem:[#allocation5 + $0xe8] ss:$16 sps:$4 sm:$0xff]  }
  0x6b   :  { %v3396_v61 = vld [vmem:[#allocation5 + $0x10c] ss:$16 sps:$4 sm:$0xff]   ;;  %v3395_v62 = vld [vmem:[#allocation5 + $0x100] ss:$16 sps:$4 sm:$0xff]   ;;  %v3399_v63 = vld [vmem:[#allocation5 + $0x124] ss:$16 sps:$4 sm:$0xff]  }
  0x6c   :  { %v3398_v0 = vld [vmem:[#allocation5 + $0x108] ss:$16 sps:$4 sm:$0xff]   ;;  %v3401_v2 = vld [vmem:[#allocation5 + $0x120] ss:$16 sps:$4 sm:$0xff]   ;;  %v3405_v3 = vld [vmem:[#allocation5 + $0x144] ss:$16 sps:$4 sm:$0xff]  }
  0x6d   :  { %v3404_v4 = vld [vmem:[#allocation5 + $0x128] ss:$16 sps:$4 sm:$0xff]   ;;  %v3408_v5 = vld [vmem:[#allocation5 + $0x14c] ss:$16 sps:$4 sm:$0xff]   ;;  %v3407_v6 = vld [vmem:[#allocation5 + $0x140] ss:$16 sps:$4 sm:$0xff]  }
  0x6e   :  { %v3411_v7 = vld [vmem:[#allocation5 + $0x164] ss:$16 sps:$4 sm:$0xff]   ;;  %v3410_v8 = vld [vmem:[#allocation5 + $0x148] ss:$16 sps:$4 sm:$0xff]   ;;  %v3414_v9 = vld [vmem:[#allocation5 + $0x16c] ss:$16 sps:$4 sm:$0xff]  }
  0x6f   :  { %v3413_v10 = vld [vmem:[#allocation5 + $0x160] ss:$16 sps:$4 sm:$0xff]  }
  0xdf   :  { %v114_v17 = vpop.permute.xlu0 %113 }
  0xe0   :  { %vm115_vm4 = vcmp.eq.s32.totalorder %v114_v17, %v111_v15  ;;  %v3419_v15 = vld [vmem:[#allocation5 + $0x180] ss:$16 sps:$4 sm:$0xff]   ;;  %v3422_v17 = vld [vmem:[#allocation5 + $0x188] ss:$16 sps:$4 sm:$0xff]  }
  0xe1   :  { %v116_v28 = vsel %vm115_vm4, 1.0, %v3948_v1  ;;  %v3402_v1 = vld [vmem:[#allocation5 + $0x12c] ss:$16 sps:$4 sm:$0xff]  }
 0x134   :  { %v217_v12 = vpop.f32.mrb[0].mxu0 }
 0x135   :  { %v219_v13 = vpop.f32.mrb[1].mxu0  ;;  %v294_v14 = vpop.f32.mrb[0].mxu1 }
 0x136   :  { %v296_v16 = vpop.f32.mrb[1].mxu1 }
 0x138   :  { %v223_v18 = vpop.f32.mrb[2].mxu0 }
 0x139   :  { %v2335_v19 = vpack.c.bf16 %v223_v18, %v217_v12  ;;  %v225_v20 = vpop.f32.mrb[3].mxu0  ;;  %v300_v21 = vpop.f32.mrb[2].mxu1  ;;  %v3417_v12 = vld [vmem:[#allocation5 + $0x184] ss:$16 sps:$4 sm:$0xff]   ;;  %v3426_v18 = vld [vmem:[#allocation5 + $0x1ac] ss:$16 sps:$4 sm:$0xff]  }
 0x13a   :  { %v2332_v22 = vpack.c.bf16 %v225_v20, %v219_v13  ;;  %v2341_v24 = vpack.c.bf16 %v300_v21, %v294_v14  ;;  %v302_v25 = vpop.f32.mrb[3].mxu1  ;;  %v3416_v13 = vld [vmem:[#allocation5 + $0x168] ss:$16 sps:$4 sm:$0xff]   ;;  %v3420_v14 = vld [vmem:[#allocation5 + $0x18c] ss:$16 sps:$4 sm:$0xff]  }
 0x13b   :  { %v2338_v26 = vpack.c.bf16 %v302_v25, %v296_v16  ;;  %v3423_v16 = vld [vmem:[#allocation5 + $0x1a4] ss:$16 sps:$4 sm:$0xff]   ;;  %v3428_v21 = vld [vmem:[#allocation5 + $0x1a8] ss:$16 sps:$4 sm:$0xff]  }
 0x13c   :  { %2334 = vmatprep.subr.msk.bf16.mxu0 %vm4091_vm2, %v2332_v22  ;;  %v3429_v20 = vld [vmem:[#allocation5 + $0x1c4] ss:$16 sps:$4 sm:$0xff]   ;;  %v3432_v22 = vld [vmem:[#allocation5 + $0x1cc] ss:$16 sps:$4 sm:$0xff]   ;;  %v3434_v25 = vld [vmem:[#allocation5 + $0x1c8] ss:$16 sps:$4 sm:$0xff]  }
 0x13d   :  { %2337 = vmatpush1.bf16.msk.msra.mxu0 %vm4091_vm2, %v2335_v19  ;;  %2340 = vmatprep.subr.msk.bf16.mxu1 %vm4091_vm2, %v2338_v26  ;;  %v3425_v19 = vld [vmem:[#allocation5 + $0x1a0] ss:$16 sps:$4 sm:$0xff]   ;;  %v3438_v26 = vld [vmem:[#allocation5 + $0x1ec] ss:$16 sps:$4 sm:$0xff]  }
 0x13e   :  { %2345 = vmatprep.subr.bf16.mxu0 %v3345_v23  ;;  %2343 = vmatpush1.bf16.msk.msra.mxu1 %vm4091_vm2, %v2341_v24  ;;  %v3431_v23 = vld [vmem:[#allocation5 + $0x1c0] ss:$16 sps:$4 sm:$0xff]   ;;  %v3435_v24 = vld [vmem:[#allocation5 + $0x1e4] ss:$16 sps:$4 sm:$0xff]  }
 0x13f   :  { %2409 = vmatprep.subr.bf16.mxu1 %v3348_v27  ;;  %v3437_v27 = vld [vmem:[#allocation5 + $0x1e0] ss:$16 sps:$4 sm:$0xff]  }
 0x140   :  { %2315 = vmatmul.mubr.msk.f32.vlgmr.msra.gmra.mrb[4].mxu0 %vm131_vm3, %v116_v28 }
 0x141   :  { %2347 = vmatpush1.bf16.msra.mxu0 %v3347_v29  ;;  %720 = vmatprep.mubr.f32.mxu0 %v306_v31  ;;  %v3440_v29 = vld [vmem:[#allocation5 + $0x1e8] ss:$16 sps:$4 sm:$0xff]  }
 0x142   :  { %2318 = vmatmul.mubr.msk.f32.vlgmr.msra.gmra.mrb[4].mxu1 %vm131_vm3, %v116_v28  ;;  %2349 = vmatprep.subr.bf16.mxu0 %v3351_v30  ;;  %v3441_v28 = vld [vmem:[#allocation8 + $0x4] ss:$16 sps:$4 sm:$0xff]   ;;  %v3444_v30 = vld [vmem:[#allocation8 + $0xc] ss:$16 sps:$4 sm:$0xff]  }
 0x143   :  { %2411 = vmatpush1.bf16.msra.mxu1 %v3350_v32  ;;  %791 = vmatprep.mubr.f32.mxu1 %v306_v31  ;;  %v305_v31 = vld [vmem:[#allocation3] sm:$0xff] }
 0x144   :  { %2413 = vmatprep.subr.bf16.mxu1 %v3354_v33  ;;  %v3443_v32 = vld [vmem:[#allocation8] ss:$16 sps:$4 sm:$0xff]   ;;  %v3447_v33 = vld [vmem:[#allocation8 + $0x24] ss:$16 sps:$4 sm:$0xff]  }
 0x145   :  { %2351 = vmatpush1.bf16.msra.mxu0 %v3353_v34  ;;  %v3446_v34 = vld [vmem:[#allocation8 + $0x8] ss:$16 sps:$4 sm:$0xff]  }
 0x146   :  { %2353 = vmatprep.subr.bf16.mxu0 %v3357_v35  ;;  %v3450_v35 = vld [vmem:[#allocation8 + $0x2c] ss:$16 sps:$4 sm:$0xff]  }
 0x147   :  { %2415 = vmatpush1.bf16.msra.mxu1 %v3356_v36  ;;  %v3449_v36 = vld [vmem:[#allocation8 + $0x20] ss:$16 sps:$4 sm:$0xff]  }
 0x148   :  { %2417 = vmatprep.subr.bf16.mxu1 %v3360_v37  ;;  %v3453_v37 = vld [vmem:[#allocation8 + $0x44] ss:$16 sps:$4 sm:$0xff]  }
 0x149   :  { %2355 = vmatpush1.bf16.msra.mxu0 %v3359_v38  ;;  %v3452_v38 = vld [vmem:[#allocation8 + $0x28] ss:$16 sps:$4 sm:$0xff]  }
 0x14a   :  { %2357 = vmatprep.subr.bf16.mxu0 %v3363_v39  ;;  %v3456_v39 = vld [vmem:[#allocation8 + $0x4c] ss:$16 sps:$4 sm:$0xff]  }
 0x14b   :  { %2419 = vmatpush1.bf16.msra.mxu1 %v3362_v40  ;;  %v3455_v40 = vld [vmem:[#allocation8 + $0x40] ss:$16 sps:$4 sm:$0xff]  }
 0x14c   :  { %2421 = vmatprep.subr.bf16.mxu1 %v3366_v41  ;;  %v3459_v41 = vld [vmem:[#allocation8 + $0x64] ss:$16 sps:$4 sm:$0xff]  }
 0x14d   :  { %2359 = vmatpush1.bf16.msra.mxu0 %v3365_v42  ;;  %v3458_v42 = vld [vmem:[#allocation8 + $0x48] ss:$16 sps:$4 sm:$0xff]  }
 0x14e   :  { %2361 = vmatprep.subr.bf16.mxu0 %v3369_v43  ;;  %v3462_v43 = vld [vmem:[#allocation8 + $0x6c] ss:$16 sps:$4 sm:$0xff]  }
 0x14f   :  { %2423 = vmatpush1.bf16.msra.mxu1 %v3368_v44  ;;  %v3461_v44 = vld [vmem:[#allocation8 + $0x60] ss:$16 sps:$4 sm:$0xff]  }
 0x150   :  { %2425 = vmatprep.subr.bf16.mxu1 %v3372_v45  ;;  %v3465_v45 = vld [vmem:[#allocation8 + $0x84] ss:$16 sps:$4 sm:$0xff]  }
 0x151   :  { %2363 = vmatpush1.bf16.msra.mxu0 %v3371_v46  ;;  %v3464_v46 = vld [vmem:[#allocation8 + $0x68] ss:$16 sps:$4 sm:$0xff]  }
 0x152   :  { %2365 = vmatprep.subr.bf16.mxu0 %v3375_v47  ;;  %v3468_v47 = vld [vmem:[#allocation8 + $0x8c] ss:$16 sps:$4 sm:$0xff]  }
 0x153   :  { %2427 = vmatpush1.bf16.msra.mxu1 %v3374_v48  ;;  %v3467_v48 = vld [vmem:[#allocation8 + $0x80] ss:$16 sps:$4 sm:$0xff]  }
 0x154   :  { %2429 = vmatprep.subr.bf16.mxu1 %v3378_v49  ;;  %v3471_v49 = vld [vmem:[#allocation8 + $0xa4] ss:$16 sps:$4 sm:$0xff]  }
 0x155   :  { %2367 = vmatpush1.bf16.msra.mxu0 %v3377_v50  ;;  %v3470_v50 = vld [vmem:[#allocation8 + $0x88] ss:$16 sps:$4 sm:$0xff]  }
 0x156   :  { %2369 = vmatprep.subr.bf16.mxu0 %v3381_v51  ;;  %v3474_v51 = vld [vmem:[#allocation8 + $0xac] ss:$16 sps:$4 sm:$0xff]  }
 0x157   :  { %2431 = vmatpush1.bf16.msra.mxu1 %v3380_v52  ;;  %v3473_v52 = vld [vmem:[#allocation8 + $0xa0] ss:$16 sps:$4 sm:$0xff]  }
 0x158   :  { %2433 = vmatprep.subr.bf16.mxu1 %v3384_v53  ;;  %v3477_v53 = vld [vmem:[#allocation8 + $0xc4] ss:$16 sps:$4 sm:$0xff]  }
 0x159   :  { %2371 = vmatpush1.bf16.msra.mxu0 %v3383_v54  ;;  %v3476_v54 = vld [vmem:[#allocation8 + $0xa8] ss:$16 sps:$4 sm:$0xff]  }
 0x15a   :  { %2373 = vmatprep.subr.bf16.mxu0 %v3387_v55  ;;  %v3480_v55 = vld [vmem:[#allocation8 + $0xcc] ss:$16 sps:$4 sm:$0xff]  }
 0x15b   :  { %2435 = vmatpush1.bf16.msra.mxu1 %v3386_v56  ;;  %v3479_v56 = vld [vmem:[#allocation8 + $0xc0] ss:$16 sps:$4 sm:$0xff]  }
 0x15c   :  { %2437 = vmatprep.subr.bf16.mxu1 %v3390_v57  ;;  %v3483_v57 = vld [vmem:[#allocation8 + $0xe4] ss:$16 sps:$4 sm:$0xff]  }
 0x15d   :  { %2375 = vmatpush1.bf16.msra.mxu0 %v3389_v58  ;;  %v3482_v58 = vld [vmem:[#allocation8 + $0xc8] ss:$16 sps:$4 sm:$0xff]  }
 0x15e   :  { %2377 = vmatprep.subr.bf16.mxu0 %v3393_v59  ;;  %v3486_v59 = vld [vmem:[#allocation8 + $0xec] ss:$16 sps:$4 sm:$0xff]  }
 0x15f   :  { %2439 = vmatpush1.bf16.msra.mxu1 %v3392_v60  ;;  %v3485_v60 = vld [vmem:[#allocation8 + $0xe0] ss:$16 sps:$4 sm:$0xff]  }
 0x160   :  { %2441 = vmatprep.subr.bf16.mxu1 %v3396_v61  ;;  %v3489_v61 = vld [vmem:[#allocation8 + $0x104] ss:$16 sps:$4 sm:$0xff]  }
 0x161   :  { %2379 = vmatpush1.bf16.msra.mxu0 %v3395_v62  ;;  %v3488_v62 = vld [vmem:[#allocation8 + $0xe8] ss:$16 sps:$4 sm:$0xff]  }
 0x162   :  { %2381 = vmatprep.subr.bf16.mxu0 %v3399_v63  ;;  %v3492_v63 = vld [vmem:[#allocation8 + $0x10c] ss:$16 sps:$4 sm:$0xff]  }
 0x163   :  { %2443 = vmatpush1.bf16.msra.mxu1 %v3398_v0  ;;  %v3491_v0 = vld [vmem:[#allocation8 + $0x100] ss:$16 sps:$4 sm:$0xff]  }
 0x164   :  { %2445 = vmatprep.subr.bf16.mxu1 %v3402_v1  ;;  %v3495_v1 = vld [vmem:[#allocation8 + $0x124] ss:$16 sps:$4 sm:$0xff]  }
 0x165   :  { %2383 = vmatpush1.bf16.msra.mxu0 %v3401_v2  ;;  %v3494_v2 = vld [vmem:[#allocation8 + $0x108] ss:$16 sps:$4 sm:$0xff]  }
 0x166   :  { %2385 = vmatprep.subr.bf16.mxu0 %v3405_v3  ;;  %v3498_v3 = vld [vmem:[#allocation8 + $0x12c] ss:$16 sps:$4 sm:$0xff]  }
 0x167   :  { %2447 = vmatpush1.bf16.msra.mxu1 %v3404_v4  ;;  %v3497_v4 = vld [vmem:[#allocation8 + $0x120] ss:$16 sps:$4 sm:$0xff]  }
 0x168   :  { %2449 = vmatprep.subr.bf16.mxu1 %v3408_v5  ;;  %v3501_v5 = vld [vmem:[#allocation8 + $0x144] ss:$16 sps:$4 sm:$0xff]  }
 0x169   :  { %2387 = vmatpush1.bf16.msra.mxu0 %v3407_v6  ;;  %v3500_v6 = vld [vmem:[#allocation8 + $0x128] ss:$16 sps:$4 sm:$0xff]  }
 0x16a   :  { %2389 = vmatprep.subr.bf16.mxu0 %v3411_v7  ;;  %v3504_v7 = vld [vmem:[#allocation8 + $0x14c] ss:$16 sps:$4 sm:$0xff]  }
 0x16b   :  { %2451 = vmatpush1.bf16.msra.mxu1 %v3410_v8  ;;  %v3503_v8 = vld [vmem:[#allocation8 + $0x140] ss:$16 sps:$4 sm:$0xff]  }
 0x16c   :  { %2453 = vmatprep.subr.bf16.mxu1 %v3414_v9  ;;  %v3507_v9 = vld [vmem:[#allocation8 + $0x164] ss:$16 sps:$4 sm:$0xff]  }
 0x16d   :  { %2391 = vmatpush1.bf16.msra.mxu0 %v3413_v10  ;;  %v3506_v10 = vld [vmem:[#allocation8 + $0x148] ss:$16 sps:$4 sm:$0xff]  }
 0x16e   :  { %2393 = vmatprep.subr.bf16.mxu0 %v3417_v12  ;;  %v3510_v12 = vld [vmem:[#allocation8 + $0x16c] ss:$16 sps:$4 sm:$0xff]  }
 0x16f   :  { %2455 = vmatpush1.bf16.msra.mxu1 %v3416_v13  ;;  %v3509_v13 = vld [vmem:[#allocation8 + $0x160] ss:$16 sps:$4 sm:$0xff]  }
 0x170   :  { %2457 = vmatprep.subr.bf16.mxu1 %v3420_v14  ;;  %v3513_v14 = vld [vmem:[#allocation8 + $0x184] ss:$16 sps:$4 sm:$0xff]  }
 0x171   :  { %2395 = vmatpush1.bf16.msra.mxu0 %v3419_v15  ;;  %v3512_v15 = vld [vmem:[#allocation8 + $0x168] ss:$16 sps:$4 sm:$0xff]  }
 0x172   :  { %2397 = vmatprep.subr.bf16.mxu0 %v3423_v16  ;;  %v3516_v16 = vld [vmem:[#allocation8 + $0x18c] ss:$16 sps:$4 sm:$0xff]  }
 0x173   :  { %2459 = vmatpush1.bf16.msra.mxu1 %v3422_v17  ;;  %v3515_v17 = vld [vmem:[#allocation8 + $0x180] ss:$16 sps:$4 sm:$0xff]  }
 0x174   :  { %2461 = vmatprep.subr.bf16.mxu1 %v3426_v18  ;;  %v3519_v18 = vld [vmem:[#allocation8 + $0x1a4] ss:$16 sps:$4 sm:$0xff]  }
 0x175   :  { %2399 = vmatpush1.bf16.msra.mxu0 %v3425_v19  ;;  %v3518_v19 = vld [vmem:[#allocation8 + $0x188] ss:$16 sps:$4 sm:$0xff]  }
 0x176   :  { %2401 = vmatprep.subr.bf16.mxu0 %v3429_v20  ;;  %v3522_v20 = vld [vmem:[#allocation8 + $0x1ac] ss:$16 sps:$4 sm:$0xff]  }
 0x177   :  { %2463 = vmatpush1.bf16.msra.mxu1 %v3428_v21  ;;  %v3521_v21 = vld [vmem:[#allocation8 + $0x1a0] ss:$16 sps:$4 sm:$0xff]  }
 0x178   :  { %2465 = vmatprep.subr.bf16.mxu1 %v3432_v22  ;;  %v3525_v22 = vld [vmem:[#allocation8 + $0x1c4] ss:$16 sps:$4 sm:$0xff]  }
 0x179   :  { %2403 = vmatpush1.bf16.msra.mxu0 %v3431_v23  ;;  %v3524_v23 = vld [vmem:[#allocation8 + $0x1a8] ss:$16 sps:$4 sm:$0xff]  }
 0x17a   :  { %2405 = vmatprep.subr.bf16.mxu0 %v3435_v24  ;;  %v3528_v24 = vld [vmem:[#allocation8 + $0x1cc] ss:$16 sps:$4 sm:$0xff]  }
 0x17b   :  { %2467 = vmatpush1.bf16.msra.mxu1 %v3434_v25  ;;  %v3527_v25 = vld [vmem:[#allocation8 + $0x1c0] ss:$16 sps:$4 sm:$0xff]  }
 0x17c   :  { %2469 = vmatprep.subr.bf16.mxu1 %v3438_v26  ;;  %v3530_v26 = vld [vmem:[#allocation8 + $0x1c8] ss:$16 sps:$4 sm:$0xff]  }
 0x17d   :  { %2407 = vmatpush1.bf16.msra.mxu0 %v3437_v27  ;;  %v3531_v27 = vld [vmem:[#allocation8 + $0x1e4] ss:$16 sps:$4 sm:$0xff]  }
 0x17e   :  { %2473 = vmatprep.subr.bf16.mxu0 %v3441_v28  ;;  %v3534_v28 = vld [vmem:[#allocation8 + $0x1ec] ss:$16 sps:$4 sm:$0xff]  }
 0x17f   :  { %2471 = vmatpush1.bf16.msra.mxu1 %v3440_v29  ;;  %v3533_v29 = vld [vmem:[#allocation8 + $0x1e0] ss:$16 sps:$4 sm:$0xff]  }
 0x180   :  { %721 = vmatmul.mubr.f32.vlgmr.msra.gmra.mrb[4].mxu0 %v305_v31  ;;  %2601 = vmatprep.subr.bf16.mxu1 %v3444_v30  ;;  %v3536_v30 = vld [vmem:[#allocation8 + $0x1e8] ss:$16 sps:$4 sm:$0xff]  }
 0x181   :  { %2475 = vmatpush1.bf16.msra.mxu0 %v3443_v32  ;;  %v3540_v32 = vld [vmem:[#allocation8 + $0x20c] ss:$16 sps:$4 sm:$0xff]  }
 0x182   :  { %792 = vmatmul.mubr.f32.vlgmr.msra.gmra.mrb[4].mxu1 %v305_v31  ;;  %2477 = vmatprep.subr.bf16.mxu0 %v3447_v33  ;;  %v3537_v31 = vld [vmem:[#allocation8 + $0x204] ss:$16 sps:$4 sm:$0xff]   ;;  %v4128_v33 = vshrl.u32 %v110_v11, 7 }
 0x183   :  { %2603 = vmatpush1.bf16.msra.mxu1 %v3446_v34 }
 0x184   :  { %2605 = vmatprep.subr.bf16.mxu1 %v3450_v35  ;;  %v4131_v34 = vsub.s32 0, %v4128_v33  ;;  %v798_v35 = vld [vmem:[%s4196_s5] sm:$0xf] }
 0x185   :  { %2479 = vmatpush1.bf16.msra.mxu0 %v3449_v36  ;;  %v4137_v36 = vsub.s32 1, %v4128_v33 }
 0x186   :  { %2481 = vmatprep.subr.bf16.mxu0 %v3453_v37  ;;  %v4140_v37 = vsub.s32 2, %v4128_v33 }
 0x187   :  { %2607 = vmatpush1.bf16.msra.mxu1 %v3452_v38  ;;  %v4143_v38 = vsub.s32 3, %v4128_v33  ;;  %v807_v11 = vrot.slane %v798_v35, %v4137_v36 }
 0x188   :  { %2609 = vmatprep.subr.bf16.mxu1 %v3456_v39  ;;  %v803_v39 = vrot.slane %v798_v35, %v4131_v34 }
 0x189   :  { %2483 = vmatpush1.bf16.msra.mxu0 %v3455_v40  ;;  %v811_v40 = vrot.slane %v798_v35, %v4140_v37 }
 0x18a   :  { %2485 = vmatprep.subr.bf16.mxu0 %v3459_v41 }
 0x18b   :  { %2611 = vmatpush1.bf16.msra.mxu1 %v3458_v42  ;;  %v815_v42 = vrot.slane %v798_v35, %v4143_v38  ;;  %v3599_v35 = vld [vmem:[#allocation8 + $0x340] ss:$16 sps:$4 sm:$0xff]  }
 0x18c   :  { %2613 = vmatprep.subr.bf16.mxu1 %v3462_v43 }
 0x18d   :  { %2487 = vmatpush1.bf16.msra.mxu0 %v3461_v44 }
 0x18e   :  { %2489 = vmatprep.subr.bf16.mxu0 %v3465_v45 }
 0x18f   :  { %2615 = vmatpush1.bf16.msra.mxu1 %v3464_v46 }
 0x190   :  { %2617 = vmatprep.subr.bf16.mxu1 %v3468_v47 }
 0x191   :  { %2491 = vmatpush1.bf16.msra.mxu0 %v3467_v48 }
 0x192   :  { %2493 = vmatprep.subr.bf16.mxu0 %v3471_v49 }
 0x193   :  { %2619 = vmatpush1.bf16.msra.mxu1 %v3470_v50 }
 0x194   :  { %2621 = vmatprep.subr.bf16.mxu1 %v3474_v51 }
 0x195   :  { %2495 = vmatpush1.bf16.msra.mxu0 %v3473_v52  ;;  %v3539_v52 = vld [vmem:[#allocation8 + $0x200] ss:$16 sps:$4 sm:$0xff]  }
 0x196   :  { %2497 = vmatprep.subr.bf16.mxu0 %v3477_v53  ;;  %v3542_v53 = vld [vmem:[#allocation8 + $0x208] ss:$16 sps:$4 sm:$0xff]  }
 0x197   :  { %2623 = vmatpush1.bf16.msra.mxu1 %v3476_v54 }
 0x198   :  { %2625 = vmatprep.subr.bf16.mxu1 %v3480_v55 }
 0x199   :  { %2499 = vmatpush1.bf16.msra.mxu0 %v3479_v56 }
 0x19a   :  { %2501 = vmatprep.subr.bf16.mxu0 %v3483_v57  ;;  %v3543_v57 = vld [vmem:[#allocation8 + $0x224] ss:$16 sps:$4 sm:$0xff]  }
 0x19b   :  { %2627 = vmatpush1.bf16.msra.mxu1 %v3482_v58  ;;  %v3546_v58 = vld [vmem:[#allocation8 + $0x22c] ss:$16 sps:$4 sm:$0xff]  }
 0x19c   :  { %2629 = vmatprep.subr.bf16.mxu1 %v3486_v59 }
 0x19d   :  { %2503 = vmatpush1.bf16.msra.mxu0 %v3485_v60  ;;  %v3545_v60 = vld [vmem:[#allocation8 + $0x220] ss:$16 sps:$4 sm:$0xff]  }
 0x19e   :  { %2505 = vmatprep.subr.bf16.mxu0 %v3489_v61  ;;  %v3548_v61 = vld [vmem:[#allocation8 + $0x228] ss:$16 sps:$4 sm:$0xff]  }
 0x19f   :  { %2631 = vmatpush1.bf16.msra.mxu1 %v3488_v62  ;;  %v3549_v62 = vld [vmem:[#allocation8 + $0x244] ss:$16 sps:$4 sm:$0xff]  }
 0x1a0   :  { %2633 = vmatprep.subr.bf16.mxu1 %v3492_v63  ;;  %v3552_v63 = vld [vmem:[#allocation8 + $0x24c] ss:$16 sps:$4 sm:$0xff]  }
 0x1a1   :  { %2507 = vmatpush1.bf16.msra.mxu0 %v3491_v0  ;;  %v3551_v0 = vld [vmem:[#allocation8 + $0x240] ss:$16 sps:$4 sm:$0xff]  }
 0x1a2   :  { %2509 = vmatprep.subr.bf16.mxu0 %v3495_v1  ;;  %v3554_v1 = vld [vmem:[#allocation8 + $0x248] ss:$16 sps:$4 sm:$0xff]  }
 0x1a3   :  { %2635 = vmatpush1.bf16.msra.mxu1 %v3494_v2  ;;  %v3555_v2 = vld [vmem:[#allocation8 + $0x264] ss:$16 sps:$4 sm:$0xff]  }
 0x1a4   :  { %2637 = vmatprep.subr.bf16.mxu1 %v3498_v3  ;;  %v3558_v3 = vld [vmem:[#allocation8 + $0x26c] ss:$16 sps:$4 sm:$0xff]  }
 0x1a5   :  { %2511 = vmatpush1.bf16.msra.mxu0 %v3497_v4  ;;  %v3557_v4 = vld [vmem:[#allocation8 + $0x260] ss:$16 sps:$4 sm:$0xff]  }
 0x1a6   :  { %2513 = vmatprep.subr.bf16.mxu0 %v3501_v5  ;;  %v3560_v5 = vld [vmem:[#allocation8 + $0x268] ss:$16 sps:$4 sm:$0xff]  }
 0x1a7   :  { %2639 = vmatpush1.bf16.msra.mxu1 %v3500_v6  ;;  %v3561_v6 = vld [vmem:[#allocation8 + $0x284] ss:$16 sps:$4 sm:$0xff]  }
 0x1a8   :  { %2641 = vmatprep.subr.bf16.mxu1 %v3504_v7  ;;  %v3564_v7 = vld [vmem:[#allocation8 + $0x28c] ss:$16 sps:$4 sm:$0xff]  }
 0x1a9   :  { %2515 = vmatpush1.bf16.msra.mxu0 %v3503_v8  ;;  %v3563_v8 = vld [vmem:[#allocation8 + $0x280] ss:$16 sps:$4 sm:$0xff]  }
 0x1aa   :  { %2517 = vmatprep.subr.bf16.mxu0 %v3507_v9  ;;  %v3566_v9 = vld [vmem:[#allocation8 + $0x288] ss:$16 sps:$4 sm:$0xff]  }
 0x1ab   :  { %2643 = vmatpush1.bf16.msra.mxu1 %v3506_v10  ;;  %v3567_v10 = vld [vmem:[#allocation8 + $0x2a4] ss:$16 sps:$4 sm:$0xff]  }
 0x1ac   :  { %2645 = vmatprep.subr.bf16.mxu1 %v3510_v12  ;;  %v3570_v12 = vld [vmem:[#allocation8 + $0x2ac] ss:$16 sps:$4 sm:$0xff]  }
 0x1ad   :  { %2519 = vmatpush1.bf16.msra.mxu0 %v3509_v13  ;;  %v3569_v13 = vld [vmem:[#allocation8 + $0x2a0] ss:$16 sps:$4 sm:$0xff]  }
 0x1ae   :  { %2521 = vmatprep.subr.bf16.mxu0 %v3513_v14  ;;  %v3572_v14 = vld [vmem:[#allocation8 + $0x2a8] ss:$16 sps:$4 sm:$0xff]  }
 0x1af   :  { %2647 = vmatpush1.bf16.msra.mxu1 %v3512_v15  ;;  %v3573_v15 = vld [vmem:[#allocation8 + $0x2c4] ss:$16 sps:$4 sm:$0xff]  }
 0x1b0   :  { %2649 = vmatprep.subr.bf16.mxu1 %v3516_v16  ;;  %v3576_v16 = vld [vmem:[#allocation8 + $0x2cc] ss:$16 sps:$4 sm:$0xff]  }
 0x1b1   :  { %2523 = vmatpush1.bf16.msra.mxu0 %v3515_v17  ;;  %v3575_v17 = vld [vmem:[#allocation8 + $0x2c0] ss:$16 sps:$4 sm:$0xff]  }
 0x1b2   :  { %2525 = vmatprep.subr.bf16.mxu0 %v3519_v18  ;;  %v3578_v18 = vld [vmem:[#allocation8 + $0x2c8] ss:$16 sps:$4 sm:$0xff]  }
 0x1b3   :  { %2651 = vmatpush1.bf16.msra.mxu1 %v3518_v19  ;;  %v3579_v19 = vld [vmem:[#allocation8 + $0x2e4] ss:$16 sps:$4 sm:$0xff]  }
 0x1b4   :  { %2653 = vmatprep.subr.bf16.mxu1 %v3522_v20  ;;  %v3582_v20 = vld [vmem:[#allocation8 + $0x2ec] ss:$16 sps:$4 sm:$0xff]  }
 0x1b5   :  { %2527 = vmatpush1.bf16.msra.mxu0 %v3521_v21  ;;  %v3581_v21 = vld [vmem:[#allocation8 + $0x2e0] ss:$16 sps:$4 sm:$0xff]  }
 0x1b6   :  { %2529 = vmatprep.subr.bf16.mxu0 %v3525_v22  ;;  %v3584_v22 = vld [vmem:[#allocation8 + $0x2e8] ss:$16 sps:$4 sm:$0xff]  }
 0x1b7   :  { %2655 = vmatpush1.bf16.msra.mxu1 %v3524_v23  ;;  %v3585_v23 = vld [vmem:[#allocation8 + $0x304] ss:$16 sps:$4 sm:$0xff]  }
 0x1b8   :  { %2657 = vmatprep.subr.bf16.mxu1 %v3528_v24  ;;  %v3588_v24 = vld [vmem:[#allocation8 + $0x30c] ss:$16 sps:$4 sm:$0xff]  }
 0x1b9   :  { %2531 = vmatpush1.bf16.msra.mxu0 %v3527_v25  ;;  %v3587_v25 = vld [vmem:[#allocation8 + $0x300] ss:$16 sps:$4 sm:$0xff]  }
 0x1ba   :  { %2533 = vmatprep.subr.bf16.mxu0 %v3531_v27  ;;  %v3591_v27 = vld [vmem:[#allocation8 + $0x324] ss:$16 sps:$4 sm:$0xff]  }
 0x1bb   :  { %2659 = vmatpush1.bf16.msra.mxu1 %v3530_v26  ;;  %v3590_v26 = vld [vmem:[#allocation8 + $0x308] ss:$16 sps:$4 sm:$0xff]  }
 0x1bc   :  { %2661 = vmatprep.subr.bf16.mxu1 %v3534_v28  ;;  %v3594_v28 = vld [vmem:[#allocation8 + $0x32c] ss:$16 sps:$4 sm:$0xff]  }
 0x1bd   :  { %2535 = vmatpush1.bf16.msra.mxu0 %v3533_v29  ;;  %v3593_v29 = vld [vmem:[#allocation8 + $0x320] ss:$16 sps:$4 sm:$0xff]  }
 0x1be   :  { %2537 = vmatprep.subr.bf16.mxu0 %v3537_v31  ;;  %v3597_v31 = vld [vmem:[#allocation8 + $0x344] ss:$16 sps:$4 sm:$0xff]  }
 0x1bf   :  { %2663 = vmatpush1.bf16.msra.mxu1 %v3536_v30  ;;  %v3596_v30 = vld [vmem:[#allocation8 + $0x328] ss:$16 sps:$4 sm:$0xff]  }
 0x1c0   :  { %2665 = vmatprep.subr.bf16.mxu1 %v3540_v32  ;;  %v3600_v32 = vld [vmem:[#allocation8 + $0x34c] ss:$16 sps:$4 sm:$0xff]  }
 0x253   :  { %v722_v41 = vpop.f32.mrb[4].mxu0 }
 0x254   :  { %v820_v43 = vadd.f32 %v803_v39, %v722_v41  ;;  %v724_v44 = vpop.f32.mrb[5].mxu0  ;;  %v3602_v39 = vld [vmem:[#allocation8 + $0x348] ss:$16 sps:$4 sm:$0xff]   ;;  %v3605_v41 = vld [vmem:[#allocation8 + $0x360] ss:$16 sps:$4 sm:$0xff]  }
 0x255   :  { %v793_v45 = vpop.f32.mrb[4].mxu1  ;;  %v821_v46 = vadd.f32 %v807_v11, %v724_v44  ;;  %v3603_v11 = vld [vmem:[#allocation8 + $0x364] ss:$16 sps:$4 sm:$0xff]   ;;  %v3612_v44 = vld [vmem:[#allocation8 + $0x38c] ss:$16 sps:$4 sm:$0xff]  }
 0x256   :  { %v828_v47 = vmul.f32 0.2, %v820_v43  ;;  %v4149_v48 = vadd.f32 %v811_v40, %v793_v45  ;;  %v795_v49 = vpop.f32.mrb[5].mxu1  ;;  %vm824_vm5 = vcmp.ge.f32.partialorder %v820_v43, 0.0  ;;  %v3606_v40 = vld [vmem:[#allocation8 + $0x36c] ss:$16 sps:$4 sm:$0xff]  }
 0x257   :  { %v829_v50 = vmul.f32 0.2, %v821_v46  ;;  %v823_v51 = vadd.f32 %v815_v42, %v795_v49  ;;  %vm825_vm6 = vcmp.ge.f32.partialorder %v821_v46, 0.0  ;;  %v3608_v42 = vld [vmem:[#allocation8 + $0x368] ss:$16 sps:$4 sm:$0xff]  }
 0x258   :  { %v832_v56 = vsel %vm824_vm5, %v820_v43, %v828_v47  ;;  %v3609_v43 = vld [vmem:[#allocation8 + $0x384] ss:$16 sps:$4 sm:$0xff]   ;;  %v3611_v45 = vld [vmem:[#allocation8 + $0x380] ss:$16 sps:$4 sm:$0xff]   ;;  %v3618_v49 = vld [vmem:[#allocation8 + $0x3ac] ss:$16 sps:$4 sm:$0xff]  }
 0x259   :  { %v831_v54 = vmul.f32 0.2, %v823_v51  ;;  %v833_v55 = vsel %vm825_vm6, %v821_v46, %v829_v50  ;;  %vm827_vm7 = vcmp.ge.f32.partialorder %v823_v51, 0.0  ;;  %v3614_v46 = vld [vmem:[#allocation8 + $0x388] ss:$16 sps:$4 sm:$0xff]   ;;  %vm826_vm8 = vcmp.ge.f32.partialorder %v4149_v48, 0.0 }
 0x25a   :  { %1306 = vmatprep.mubr.f32.mxu0 %v833_v55  ;;  %1448 = vmatprep.mubr.f32.mxu1 %v833_v55  ;;  %v3615_v47 = vld [vmem:[#allocation8 + $0x3a4] ss:$16 sps:$4 sm:$0xff]   ;;  %v3617_v50 = vld [vmem:[#allocation8 + $0x3a0] ss:$16 sps:$4 sm:$0xff]   ;;  %v3626_v55 = vld [vmem:[#allocation8 + $0x3c8] ss:$16 sps:$4 sm:$0xff]  }
 0x25b   :  { %1307 = vmatmul.mubr.f32.vlgmr.msra.gmra.mrb[6].mxu0 %v832_v56  ;;  %1449 = vmatmul.mubr.f32.vlgmr.msra.gmra.mrb[6].mxu1 %v832_v56  ;;  %v835_v59 = vsel %vm827_vm7, %v823_v51, %v831_v54  ;;  %v3620_v51 = vld [vmem:[#allocation8 + $0x3a8] ss:$16 sps:$4 sm:$0xff]   ;;  %v3623_v54 = vld [vmem:[#allocation8 + $0x3c0] ss:$16 sps:$4 sm:$0xff]   ;;  %v3627_v56 = vld [vmem:[#allocation8 + $0x3e4] ss:$16 sps:$4 sm:$0xff]  }
 0x25c   :  { %2539 = vmatpush1.bf16.msra.mxu0 %v3539_v52  ;;  %2667 = vmatpush1.bf16.msra.mxu1 %v3542_v53  ;;  %v3621_v52 = vld [vmem:[#allocation8 + $0x3c4] ss:$16 sps:$4 sm:$0xff]   ;;  %v3624_v53 = vld [vmem:[#allocation8 + $0x3cc] ss:$16 sps:$4 sm:$0xff]  }
 0x25d   :  { %1377 = vmatprep.mubr.f32.mxu0 %v835_v59  ;;  %1519 = vmatprep.mubr.f32.mxu1 %v835_v59  ;;  %v3632_v59 = vld [vmem:[#allocation8 + $0x3e8] ss:$16 sps:$4 sm:$0xff]  }
 0x25e   :  { %2541 = vmatprep.subr.bf16.mxu0 %v3543_v57  ;;  %2669 = vmatprep.subr.bf16.mxu1 %v3546_v58  ;;  %v3630_v57 = vld [vmem:[#allocation8 + $0x3ec] ss:$16 sps:$4 sm:$0xff]   ;;  %v3629_v58 = vld [vmem:[#allocation8 + $0x3e0] ss:$16 sps:$4 sm:$0xff]  }
 0x260   :  { %2543 = vmatpush1.bf16.msra.mxu0 %v3545_v60  ;;  %2671 = vmatpush1.bf16.msra.mxu1 %v3548_v61  ;;  %v3633_v60 = vld [vmem:[#allocation10 + $0x4] ss:$16 sps:$4 sm:$0xff]   ;;  %v3636_v61 = vld [vmem:[#allocation10 + $0xc] ss:$16 sps:$4 sm:$0xff]  }
 0x261   :  { %2545 = vmatprep.subr.bf16.mxu0 %v3549_v62  ;;  %2673 = vmatprep.subr.bf16.mxu1 %v3552_v63  ;;  %v830_v62 = vmul.f32 0.2, %v4149_v48  ;;  %v3635_v63 = vld [vmem:[#allocation10] ss:$16 sps:$4 sm:$0xff]  }
 0x264   :  { %2547 = vmatpush1.bf16.msra.mxu0 %v3551_v0  ;;  %2675 = vmatpush1.bf16.msra.mxu1 %v3554_v1  ;;  %v3638_v0 = vld [vmem:[#allocation10 + $0x8] ss:$16 sps:$4 sm:$0xff]   ;;  %v3639_v1 = vld [vmem:[#allocation10 + $0x24] ss:$16 sps:$4 sm:$0xff]  }
 0x265   :  { %2549 = vmatprep.subr.bf16.mxu0 %v3555_v2  ;;  %2677 = vmatprep.subr.bf16.mxu1 %v3558_v3  ;;  %v3642_v2 = vld [vmem:[#allocation10 + $0x2c] ss:$16 sps:$4 sm:$0xff]   ;;  %v834_v3 = vsel %vm826_vm8, %v4149_v48, %v830_v62  ;;  %v3653_v48 = vld [vmem:[#allocation10 + $0x60] ss:$16 sps:$4 sm:$0xff]   ;;  %v3722_v62 = vld [vmem:[#allocation10 + $0x1c8] ss:$16 sps:$4 sm:$0xff]  }
 0x268   :  { %2551 = vmatpush1.bf16.msra.mxu0 %v3557_v4  ;;  %2679 = vmatpush1.bf16.msra.mxu1 %v3560_v5  ;;  %v3641_v4 = vld [vmem:[#allocation10 + $0x20] ss:$16 sps:$4 sm:$0xff]   ;;  %v3644_v5 = vld [vmem:[#allocation10 + $0x28] ss:$16 sps:$4 sm:$0xff]  }
 0x269   :  { %2553 = vmatprep.subr.bf16.mxu0 %v3561_v6  ;;  %2681 = vmatprep.subr.bf16.mxu1 %v3564_v7  ;;  %v3645_v6 = vld [vmem:[#allocation10 + $0x44] ss:$16 sps:$4 sm:$0xff]   ;;  %v3648_v7 = vld [vmem:[#allocation10 + $0x4c] ss:$16 sps:$4 sm:$0xff]  }
 0x26c   :  { %2555 = vmatpush1.bf16.msra.mxu0 %v3563_v8  ;;  %2683 = vmatpush1.bf16.msra.mxu1 %v3566_v9  ;;  %v3647_v8 = vld [vmem:[#allocation10 + $0x40] ss:$16 sps:$4 sm:$0xff]   ;;  %v3650_v9 = vld [vmem:[#allocation10 + $0x48] ss:$16 sps:$4 sm:$0xff]  }
 0x26d   :  { %2557 = vmatprep.subr.bf16.mxu0 %v3567_v10  ;;  %2685 = vmatprep.subr.bf16.mxu1 %v3570_v12  ;;  %v3651_v10 = vld [vmem:[#allocation10 + $0x64] ss:$16 sps:$4 sm:$0xff]   ;;  %v3654_v12 = vld [vmem:[#allocation10 + $0x6c] ss:$16 sps:$4 sm:$0xff]  }
 0x270   :  { %2559 = vmatpush1.bf16.msra.mxu0 %v3569_v13  ;;  %2687 = vmatpush1.bf16.msra.mxu1 %v3572_v14  ;;  %v3656_v13 = vld [vmem:[#allocation10 + $0x68] ss:$16 sps:$4 sm:$0xff]   ;;  %v3657_v14 = vld [vmem:[#allocation10 + $0x84] ss:$16 sps:$4 sm:$0xff]  }
 0x271   :  { %2561 = vmatprep.subr.bf16.mxu0 %v3573_v15  ;;  %2689 = vmatprep.subr.bf16.mxu1 %v3576_v16  ;;  %v3660_v15 = vld [vmem:[#allocation10 + $0x8c] ss:$16 sps:$4 sm:$0xff]   ;;  %v3659_v16 = vld [vmem:[#allocation10 + $0x80] ss:$16 sps:$4 sm:$0xff]  }
 0x274   :  { %2563 = vmatpush1.bf16.msra.mxu0 %v3575_v17  ;;  %2691 = vmatpush1.bf16.msra.mxu1 %v3578_v18  ;;  %v3662_v17 = vld [vmem:[#allocation10 + $0x88] ss:$16 sps:$4 sm:$0xff]   ;;  %v3663_v18 = vld [vmem:[#allocation10 + $0xa4] ss:$16 sps:$4 sm:$0xff]  }
 0x275   :  { %2565 = vmatprep.subr.bf16.mxu0 %v3579_v19  ;;  %2693 = vmatprep.subr.bf16.mxu1 %v3582_v20  ;;  %v3666_v19 = vld [vmem:[#allocation10 + $0xac] ss:$16 sps:$4 sm:$0xff]   ;;  %v3665_v20 = vld [vmem:[#allocation10 + $0xa0] ss:$16 sps:$4 sm:$0xff]  }
 0x278   :  { %2567 = vmatpush1.bf16.msra.mxu0 %v3581_v21  ;;  %2695 = vmatpush1.bf16.msra.mxu1 %v3584_v22  ;;  %v3668_v21 = vld [vmem:[#allocation10 + $0xa8] ss:$16 sps:$4 sm:$0xff]   ;;  %v3669_v22 = vld [vmem:[#allocation10 + $0xc4] ss:$16 sps:$4 sm:$0xff]  }
 0x279   :  { %2569 = vmatprep.subr.bf16.mxu0 %v3585_v23  ;;  %2697 = vmatprep.subr.bf16.mxu1 %v3588_v24  ;;  %v3672_v23 = vld [vmem:[#allocation10 + $0xcc] ss:$16 sps:$4 sm:$0xff]   ;;  %v3671_v24 = vld [vmem:[#allocation10 + $0xc0] ss:$16 sps:$4 sm:$0xff]  }
 0x27c   :  { %2571 = vmatpush1.bf16.msra.mxu0 %v3587_v25  ;;  %2699 = vmatpush1.bf16.msra.mxu1 %v3590_v26  ;;  %v3674_v25 = vld [vmem:[#allocation10 + $0xc8] ss:$16 sps:$4 sm:$0xff]   ;;  %v3675_v26 = vld [vmem:[#allocation10 + $0xe4] ss:$16 sps:$4 sm:$0xff]  }
 0x27d   :  { %2573 = vmatprep.subr.bf16.mxu0 %v3591_v27  ;;  %2701 = vmatprep.subr.bf16.mxu1 %v3594_v28  ;;  %v3678_v27 = vld [vmem:[#allocation10 + $0xec] ss:$16 sps:$4 sm:$0xff]   ;;  %v3677_v28 = vld [vmem:[#allocation10 + $0xe0] ss:$16 sps:$4 sm:$0xff]  }
 0x280   :  { %2575 = vmatpush1.bf16.msra.mxu0 %v3593_v29  ;;  %2703 = vmatpush1.bf16.msra.mxu1 %v3596_v30  ;;  %v3680_v29 = vld [vmem:[#allocation10 + $0xe8] ss:$16 sps:$4 sm:$0xff]   ;;  %v3681_v30 = vld [vmem:[#allocation10 + $0x104] ss:$16 sps:$4 sm:$0xff]  }
 0x281   :  { %2577 = vmatprep.subr.bf16.mxu0 %v3597_v31  ;;  %2705 = vmatprep.subr.bf16.mxu1 %v3600_v32  ;;  %v3684_v31 = vld [vmem:[#allocation10 + $0x10c] ss:$16 sps:$4 sm:$0xff]   ;;  %v3683_v32 = vld [vmem:[#allocation10 + $0x100] ss:$16 sps:$4 sm:$0xff]  }
 0x284   :  { %2579 = vmatpush1.bf16.msra.mxu0 %v3599_v35  ;;  %2707 = vmatpush1.bf16.msra.mxu1 %v3602_v39  ;;  %v3686_v35 = vld [vmem:[#allocation10 + $0x108] ss:$16 sps:$4 sm:$0xff]   ;;  %v3687_v39 = vld [vmem:[#allocation10 + $0x124] ss:$16 sps:$4 sm:$0xff]  }
 0x285   :  { %2581 = vmatprep.subr.bf16.mxu0 %v3603_v11  ;;  %2709 = vmatprep.subr.bf16.mxu1 %v3606_v40  ;;  %v3690_v11 = vld [vmem:[#allocation10 + $0x12c] ss:$16 sps:$4 sm:$0xff]   ;;  %v3689_v40 = vld [vmem:[#allocation10 + $0x120] ss:$16 sps:$4 sm:$0xff]  }
 0x288   :  { %2583 = vmatpush1.bf16.msra.mxu0 %v3605_v41  ;;  %2711 = vmatpush1.bf16.msra.mxu1 %v3608_v42  ;;  %v3692_v41 = vld [vmem:[#allocation10 + $0x128] ss:$16 sps:$4 sm:$0xff]   ;;  %v3693_v42 = vld [vmem:[#allocation10 + $0x144] ss:$16 sps:$4 sm:$0xff]  }
 0x289   :  { %2585 = vmatprep.subr.bf16.mxu0 %v3609_v43  ;;  %2713 = vmatprep.subr.bf16.mxu1 %v3612_v44  ;;  %v3696_v43 = vld [vmem:[#allocation10 + $0x14c] ss:$16 sps:$4 sm:$0xff]   ;;  %v3695_v44 = vld [vmem:[#allocation10 + $0x140] ss:$16 sps:$4 sm:$0xff]  }
 0x28c   :  { %2587 = vmatpush1.bf16.msra.mxu0 %v3611_v45  ;;  %2715 = vmatpush1.bf16.msra.mxu1 %v3614_v46  ;;  %v3698_v45 = vld [vmem:[#allocation10 + $0x148] ss:$16 sps:$4 sm:$0xff]   ;;  %v3699_v46 = vld [vmem:[#allocation10 + $0x164] ss:$16 sps:$4 sm:$0xff]  }
 0x28d   :  { %2589 = vmatprep.subr.bf16.mxu0 %v3615_v47  ;;  %2717 = vmatprep.subr.bf16.mxu1 %v3618_v49  ;;  %v3702_v47 = vld [vmem:[#allocation10 + $0x16c] ss:$16 sps:$4 sm:$0xff]   ;;  %v3701_v49 = vld [vmem:[#allocation10 + $0x160] ss:$16 sps:$4 sm:$0xff]  }
 0x290   :  { %2591 = vmatpush1.bf16.msra.mxu0 %v3617_v50  ;;  %2719 = vmatpush1.bf16.msra.mxu1 %v3620_v51  ;;  %v3704_v50 = vld [vmem:[#allocation10 + $0x168] ss:$16 sps:$4 sm:$0xff]   ;;  %v3705_v51 = vld [vmem:[#allocation10 + $0x184] ss:$16 sps:$4 sm:$0xff]  }
 0x291   :  { %2593 = vmatprep.subr.bf16.mxu0 %v3621_v52  ;;  %2721 = vmatprep.subr.bf16.mxu1 %v3624_v53  ;;  %v3708_v52 = vld [vmem:[#allocation10 + $0x18c] ss:$16 sps:$4 sm:$0xff]   ;;  %v3707_v53 = vld [vmem:[#allocation10 + $0x180] ss:$16 sps:$4 sm:$0xff]  }
 0x294   :  { %2595 = vmatpush1.bf16.msra.mxu0 %v3623_v54  ;;  %2723 = vmatpush1.bf16.msra.mxu1 %v3626_v55  ;;  %v3710_v54 = vld [vmem:[#allocation10 + $0x188] ss:$16 sps:$4 sm:$0xff]   ;;  %v3711_v55 = vld [vmem:[#allocation10 + $0x1a4] ss:$16 sps:$4 sm:$0xff]  }
 0x295   :  { %2597 = vmatprep.subr.bf16.mxu0 %v3627_v56  ;;  %2725 = vmatprep.subr.bf16.mxu1 %v3630_v57  ;;  %v3714_v56 = vld [vmem:[#allocation10 + $0x1ac] ss:$16 sps:$4 sm:$0xff]   ;;  %v3713_v57 = vld [vmem:[#allocation10 + $0x1a0] ss:$16 sps:$4 sm:$0xff]  }
 0x298   :  { %2599 = vmatpush1.bf16.msra.mxu0 %v3629_v58  ;;  %2727 = vmatpush1.bf16.msra.mxu1 %v3632_v59  ;;  %v3716_v58 = vld [vmem:[#allocation10 + $0x1a8] ss:$16 sps:$4 sm:$0xff]   ;;  %v3717_v59 = vld [vmem:[#allocation10 + $0x1c4] ss:$16 sps:$4 sm:$0xff]  }
 0x299   :  { %2729 = vmatprep.subr.bf16.mxu0 %v3633_v60  ;;  %2857 = vmatprep.subr.bf16.mxu1 %v3636_v61  ;;  %v3720_v60 = vld [vmem:[#allocation10 + $0x1cc] ss:$16 sps:$4 sm:$0xff]   ;;  %v3719_v61 = vld [vmem:[#allocation10 + $0x1c0] ss:$16 sps:$4 sm:$0xff]  }
 0x29b   :  { %1378 = vmatmul.mubr.f32.vlgmr.msra.gmra.mrb[6].mxu0 %v834_v3  ;;  %1520 = vmatmul.mubr.f32.vlgmr.msra.gmra.mrb[6].mxu1 %v834_v3  ;;  %v3729_v3 = vld [vmem:[#allocation10 + $0x204] ss:$16 sps:$4 sm:$0xff]  }
 0x29c   :  { %2731 = vmatpush1.bf16.msra.mxu0 %v3635_v63  ;;  %2859 = vmatpush1.bf16.msra.mxu1 %v3638_v0  ;;  %v3723_v63 = vld [vmem:[#allocation10 + $0x1e4] ss:$16 sps:$4 sm:$0xff]   ;;  %v3726_v0 = vld [vmem:[#allocation10 + $0x1ec] ss:$16 sps:$4 sm:$0xff]  }
 0x29d   :  { %2733 = vmatprep.subr.bf16.mxu0 %v3639_v1  ;;  %2861 = vmatprep.subr.bf16.mxu1 %v3642_v2  ;;  %v3725_v1 = vld [vmem:[#allocation10 + $0x1e0] ss:$16 sps:$4 sm:$0xff]   ;;  %v3728_v2 = vld [vmem:[#allocation10 + $0x1e8] ss:$16 sps:$4 sm:$0xff]  }
 0x2a0   :  { %2735 = vmatpush1.bf16.msra.mxu0 %v3641_v4  ;;  %2863 = vmatpush1.bf16.msra.mxu1 %v3644_v5  ;;  %v3732_v4 = vld [vmem:[#allocation10 + $0x20c] ss:$16 sps:$4 sm:$0xff]  }
 0x2a1   :  { %2737 = vmatprep.subr.bf16.mxu0 %v3645_v6  ;;  %2865 = vmatprep.subr.bf16.mxu1 %v3648_v7  ;;  %v4157_v5 = vld [vmem:[%s4198_s7] sm:$0xf] }
 0x2a2   :  { %v1225_v6 = vrot.slane %v4157_v5, %v4131_v34  ;;  %v1229_v7 = vrot.slane %v4157_v5, %v4137_v36 }
 0x2a4   :  { %2739 = vmatpush1.bf16.msra.mxu0 %v3647_v8  ;;  %2867 = vmatpush1.bf16.msra.mxu1 %v3650_v9  ;;  %v1237_v8 = vrot.slane %v4157_v5, %v4143_v38 }
 0x2a5   :  { %2741 = vmatprep.subr.bf16.mxu0 %v3651_v10  ;;  %2869 = vmatprep.subr.bf16.mxu1 %v3654_v12 }
 0x2a8   :  { %2743 = vmatpush1.bf16.msra.mxu0 %v3653_v48  ;;  %2871 = vmatpush1.bf16.msra.mxu1 %v3656_v13 }
 0x2a9   :  { %2745 = vmatprep.subr.bf16.mxu0 %v3657_v14  ;;  %2873 = vmatprep.subr.bf16.mxu1 %v3660_v15 }
 0x2ac   :  { %2747 = vmatpush1.bf16.msra.mxu0 %v3659_v16  ;;  %2875 = vmatpush1.bf16.msra.mxu1 %v3662_v17 }
 0x2ad   :  { %2749 = vmatprep.subr.bf16.mxu0 %v3663_v18  ;;  %2877 = vmatprep.subr.bf16.mxu1 %v3666_v19  ;;  %v3731_v19 = vld [vmem:[#allocation10 + $0x200] ss:$16 sps:$4 sm:$0xff]  }
 0x2b0   :  { %2751 = vmatpush1.bf16.msra.mxu0 %v3665_v20  ;;  %2879 = vmatpush1.bf16.msra.mxu1 %v3668_v21  ;;  %v3734_v20 = vld [vmem:[#allocation10 + $0x208] ss:$16 sps:$4 sm:$0xff]  }
 0x2b1   :  { %2753 = vmatprep.subr.bf16.mxu0 %v3669_v22  ;;  %2881 = vmatprep.subr.bf16.mxu1 %v3672_v23  ;;  %v3735_v23 = vld [vmem:[#allocation10 + $0x224] ss:$16 sps:$4 sm:$0xff]  }
 0x2b4   :  { %2755 = vmatpush1.bf16.msra.mxu0 %v3671_v24  ;;  %2883 = vmatpush1.bf16.msra.mxu1 %v3674_v25  ;;  %v3738_v24 = vld [vmem:[#allocation10 + $0x22c] ss:$16 sps:$4 sm:$0xff]  }
 0x2b5   :  { %2757 = vmatprep.subr.bf16.mxu0 %v3675_v26  ;;  %2885 = vmatprep.subr.bf16.mxu1 %v3678_v27  ;;  %v3737_v26 = vld [vmem:[#allocation10 + $0x220] ss:$16 sps:$4 sm:$0xff]   ;;  %v3740_v27 = vld [vmem:[#allocation10 + $0x228] ss:$16 sps:$4 sm:$0xff]  }
 0x2b8   :  { %2759 = vmatpush1.bf16.msra.mxu0 %v3677_v28  ;;  %2887 = vmatpush1.bf16.msra.mxu1 %v3680_v29  ;;  %v3741_v28 = vld [vmem:[#allocation10 + $0x244] ss:$16 sps:$4 sm:$0xff]   ;;  %v3744_v29 = vld [vmem:[#allocation10 + $0x24c] ss:$16 sps:$4 sm:$0xff]  }
 0x2b9   :  { %2761 = vmatprep.subr.bf16.mxu0 %v3681_v30  ;;  %2889 = vmatprep.subr.bf16.mxu1 %v3684_v31  ;;  %v3743_v30 = vld [vmem:[#allocation10 + $0x240] ss:$16 sps:$4 sm:$0xff]   ;;  %v3746_v31 = vld [vmem:[#allocation10 + $0x248] ss:$16 sps:$4 sm:$0xff]  }
 0x2bc   :  { %2763 = vmatpush1.bf16.msra.mxu0 %v3683_v32  ;;  %2891 = vmatpush1.bf16.msra.mxu1 %v3686_v35  ;;  %v3747_v32 = vld [vmem:[#allocation10 + $0x264] ss:$16 sps:$4 sm:$0xff]   ;;  %v3750_v35 = vld [vmem:[#allocation10 + $0x26c] ss:$16 sps:$4 sm:$0xff]  }
 0x2bd   :  { %2765 = vmatprep.subr.bf16.mxu0 %v3687_v39  ;;  %2893 = vmatprep.subr.bf16.mxu1 %v3690_v11  ;;  %v3749_v39 = vld [vmem:[#allocation10 + $0x260] ss:$16 sps:$4 sm:$0xff]   ;;  %v3752_v11 = vld [vmem:[#allocation10 + $0x268] ss:$16 sps:$4 sm:$0xff]  }
 0x2c0   :  { %2767 = vmatpush1.bf16.msra.mxu0 %v3689_v40  ;;  %2895 = vmatpush1.bf16.msra.mxu1 %v3692_v41  ;;  %v3753_v40 = vld [vmem:[#allocation10 + $0x284] ss:$16 sps:$4 sm:$0xff]   ;;  %v3756_v41 = vld [vmem:[#allocation10 + $0x28c] ss:$16 sps:$4 sm:$0xff]  }
 0x2c1   :  { %2769 = vmatprep.subr.bf16.mxu0 %v3693_v42  ;;  %2897 = vmatprep.subr.bf16.mxu1 %v3696_v43  ;;  %v3755_v42 = vld [vmem:[#allocation10 + $0x280] ss:$16 sps:$4 sm:$0xff]   ;;  %v3758_v43 = vld [vmem:[#allocation10 + $0x288] ss:$16 sps:$4 sm:$0xff]  }
 0x2c4   :  { %2771 = vmatpush1.bf16.msra.mxu0 %v3695_v44  ;;  %2899 = vmatpush1.bf16.msra.mxu1 %v3698_v45  ;;  %v3759_v44 = vld [vmem:[#allocation10 + $0x2a4] ss:$16 sps:$4 sm:$0xff]   ;;  %v3762_v45 = vld [vmem:[#allocation10 + $0x2ac] ss:$16 sps:$4 sm:$0xff]  }
 0x2c5   :  { %2773 = vmatprep.subr.bf16.mxu0 %v3699_v46  ;;  %2901 = vmatprep.subr.bf16.mxu1 %v3702_v47  ;;  %v3761_v46 = vld [vmem:[#allocation10 + $0x2a0] ss:$16 sps:$4 sm:$0xff]   ;;  %v3764_v47 = vld [vmem:[#allocation10 + $0x2a8] ss:$16 sps:$4 sm:$0xff]  }
 0x2c8   :  { %2775 = vmatpush1.bf16.msra.mxu0 %v3701_v49  ;;  %2903 = vmatpush1.bf16.msra.mxu1 %v3704_v50  ;;  %v3765_v49 = vld [vmem:[#allocation10 + $0x2c4] ss:$16 sps:$4 sm:$0xff]   ;;  %v3768_v50 = vld [vmem:[#allocation10 + $0x2cc] ss:$16 sps:$4 sm:$0xff]  }
 0x2c9   :  { %2777 = vmatprep.subr.bf16.mxu0 %v3705_v51  ;;  %2905 = vmatprep.subr.bf16.mxu1 %v3708_v52  ;;  %v3767_v51 = vld [vmem:[#allocation10 + $0x2c0] ss:$16 sps:$4 sm:$0xff]   ;;  %v3770_v52 = vld [vmem:[#allocation10 + $0x2c8] ss:$16 sps:$4 sm:$0xff]  }
 0x2cc   :  { %2779 = vmatpush1.bf16.msra.mxu0 %v3707_v53  ;;  %2907 = vmatpush1.bf16.msra.mxu1 %v3710_v54  ;;  %v3771_v53 = vld [vmem:[#allocation10 + $0x2e4] ss:$16 sps:$4 sm:$0xff]   ;;  %v3774_v54 = vld [vmem:[#allocation10 + $0x2ec] ss:$16 sps:$4 sm:$0xff]  }
 0x2cd   :  { %2781 = vmatprep.subr.bf16.mxu0 %v3711_v55  ;;  %2909 = vmatprep.subr.bf16.mxu1 %v3714_v56  ;;  %v3773_v55 = vld [vmem:[#allocation10 + $0x2e0] ss:$16 sps:$4 sm:$0xff]   ;;  %v3776_v56 = vld [vmem:[#allocation10 + $0x2e8] ss:$16 sps:$4 sm:$0xff]  }
 0x2d0   :  { %2783 = vmatpush1.bf16.msra.mxu0 %v3713_v57  ;;  %2911 = vmatpush1.bf16.msra.mxu1 %v3716_v58  ;;  %v3777_v57 = vld [vmem:[#allocation10 + $0x304] ss:$16 sps:$4 sm:$0xff]   ;;  %v3780_v58 = vld [vmem:[#allocation10 + $0x30c] ss:$16 sps:$4 sm:$0xff]  }
 0x2d1   :  { %2785 = vmatprep.subr.bf16.mxu0 %v3717_v59  ;;  %2913 = vmatprep.subr.bf16.mxu1 %v3720_v60  ;;  %v3779_v59 = vld [vmem:[#allocation10 + $0x300] ss:$16 sps:$4 sm:$0xff]   ;;  %v3782_v60 = vld [vmem:[#allocation10 + $0x308] ss:$16 sps:$4 sm:$0xff]  }
 0x2d4   :  { %2787 = vmatpush1.bf16.msra.mxu0 %v3719_v61  ;;  %2915 = vmatpush1.bf16.msra.mxu1 %v3722_v62  ;;  %v3783_v61 = vld [vmem:[#allocation10 + $0x324] ss:$16 sps:$4 sm:$0xff]   ;;  %v3786_v62 = vld [vmem:[#allocation10 + $0x32c] ss:$16 sps:$4 sm:$0xff]  }
 0x2d5   :  { %2789 = vmatprep.subr.bf16.mxu0 %v3723_v63  ;;  %2917 = vmatprep.subr.bf16.mxu1 %v3726_v0  ;;  %v3785_v63 = vld [vmem:[#allocation10 + $0x320] ss:$16 sps:$4 sm:$0xff]   ;;  %v3788_v0 = vld [vmem:[#allocation10 + $0x328] ss:$16 sps:$4 sm:$0xff]  }
 0x2d8   :  { %2791 = vmatpush1.bf16.msra.mxu0 %v3725_v1  ;;  %2919 = vmatpush1.bf16.msra.mxu1 %v3728_v2  ;;  %v3789_v1 = vld [vmem:[#allocation10 + $0x344] ss:$16 sps:$4 sm:$0xff]   ;;  %v3792_v2 = vld [vmem:[#allocation10 + $0x34c] ss:$16 sps:$4 sm:$0xff]  }
 0x2d9   :  { %2793 = vmatprep.subr.bf16.mxu0 %v3729_v3  ;;  %2921 = vmatprep.subr.bf16.mxu1 %v3732_v4  ;;  %v3791_v3 = vld [vmem:[#allocation10 + $0x340] ss:$16 sps:$4 sm:$0xff]   ;;  %v3794_v4 = vld [vmem:[#allocation10 + $0x348] ss:$16 sps:$4 sm:$0xff]  }
 0x36e   :  { %v1379_v9 = vpop.f32.mrb[6].mxu0  ;;  %v4165_v10 = vpop.f32.mrb[6].mxu1 }
 0x36f   :  { %v2984_v12 = vadd.f32 %v1379_v9, %v1225_v6  ;;  %v1381_v48 = vpop.f32.mrb[7].mxu0  ;;  %v1523_v13 = vpop.f32.mrb[7].mxu1  ;;  %v3795_v6 = vld [vmem:[#allocation10 + $0x364] ss:$16 sps:$4 sm:$0xff]   ;;  %v3800_v9 = vld [vmem:[#allocation10 + $0x368] ss:$16 sps:$4 sm:$0xff]  }
 0x370   :  { %v2985_v14 = vadd.f32 %v1381_v48, %v1229_v7  ;;  %v2987_v15 = vadd.f32 %v1523_v13, %v1237_v8  ;;  %v3798_v7 = vld [vmem:[#allocation10 + $0x36c] ss:$16 sps:$4 sm:$0xff]   ;;  %v3797_v8 = vld [vmem:[#allocation10 + $0x360] ss:$16 sps:$4 sm:$0xff]  }
 0x371   :  { %v1530_v16 = vmul.f32 0.2, %v2984_v12  ;;  %vm1526_vm9 = vcmp.ge.f32.partialorder %v2984_v12, 0.0  ;;  %v3804_v48 = vld [vmem:[#allocation10 + $0x38c] ss:$16 sps:$4 sm:$0xff]  }
 0x372   :  { %v1531_v17 = vmul.f32 0.2, %v2985_v14  ;;  %vm1527_vm10 = vcmp.ge.f32.partialorder %v2985_v14, 0.0  ;;  %v1533_v18 = vmul.f32 0.2, %v2987_v15  ;;  %vm1529_vm11 = vcmp.ge.f32.partialorder %v2987_v15, 0.0 }
 0x373   :  { %v1534_v22 = vsel %vm1526_vm9, %v2984_v12, %v1530_v16  ;;  %v3801_v12 = vld [vmem:[#allocation10 + $0x384] ss:$16 sps:$4 sm:$0xff]   ;;  %v3803_v13 = vld [vmem:[#allocation10 + $0x380] ss:$16 sps:$4 sm:$0xff]   ;;  %v3810_v16 = vld [vmem:[#allocation10 + $0x3ac] ss:$16 sps:$4 sm:$0xff]  }
 0x374   :  { %v1535_v21 = vsel %vm1527_vm10, %v2985_v14, %v1531_v17  ;;  %v1537_v25 = vsel %vm1529_vm11, %v2987_v15, %v1533_v18  ;;  %v3806_v14 = vld [vmem:[#allocation10 + $0x388] ss:$16 sps:$4 sm:$0xff]   ;;  %v3807_v15 = vld [vmem:[#allocation10 + $0x3a4] ss:$16 sps:$4 sm:$0xff]   ;;  %v3809_v17 = vld [vmem:[#allocation10 + $0x3a0] ss:$16 sps:$4 sm:$0xff]  }
 0x375   :  { %2008 = vmatprep.mubr.f32.mxu0 %v1535_v21  ;;  %2150 = vmatprep.mubr.f32.mxu1 %v1535_v21  ;;  %v3812_v18 = vld [vmem:[#allocation10 + $0x3a8] ss:$16 sps:$4 sm:$0xff]   ;;  %v1233_v21 = vrot.slane %v4157_v5, %v4140_v37 }
 0x376   :  { %2009 = vmatmul.mubr.f32.vlgmr.msra.gmra.mrb[8].mxu0 %v1534_v22  ;;  %2151 = vmatmul.mubr.f32.vlgmr.msra.gmra.mrb[8].mxu1 %v1534_v22  ;;  %v3815_v22 = vld [vmem:[#allocation10 + $0x3c0] ss:$16 sps:$4 sm:$0xff]  }
 0x377   :  { %2795 = vmatpush1.bf16.msra.mxu0 %v3731_v19  ;;  %2923 = vmatpush1.bf16.msra.mxu1 %v3734_v20  ;;  %v3813_v19 = vld [vmem:[#allocation10 + $0x3c4] ss:$16 sps:$4 sm:$0xff]   ;;  %v3816_v20 = vld [vmem:[#allocation10 + $0x3cc] ss:$16 sps:$4 sm:$0xff]  }
 0x378   :  { %2079 = vmatprep.mubr.f32.mxu0 %v1537_v25  ;;  %2221 = vmatprep.mubr.f32.mxu1 %v1537_v25  ;;  %v3822_v25 = vld [vmem:[#allocation10 + $0x3ec] ss:$16 sps:$4 sm:$0xff]  }
 0x379   :  { %2797 = vmatprep.subr.bf16.mxu0 %v3735_v23  ;;  %2925 = vmatprep.subr.bf16.mxu1 %v3738_v24  ;;  %v3818_v23 = vld [vmem:[#allocation10 + $0x3c8] ss:$16 sps:$4 sm:$0xff]   ;;  %v3819_v24 = vld [vmem:[#allocation10 + $0x3e4] ss:$16 sps:$4 sm:$0xff]  }
 0x37b   :  { %2799 = vmatpush1.bf16.msra.mxu0 %v3737_v26  ;;  %2927 = vmatpush1.bf16.msra.mxu1 %v3740_v27  ;;  %v2986_v26 = vadd.f32 %v4165_v10, %v1233_v21  ;;  %v3821_v27 = vld [vmem:[#allocation10 + $0x3e0] ss:$16 sps:$4 sm:$0xff]  }
 0x37c   :  { %2801 = vmatprep.subr.bf16.mxu0 %v3741_v28  ;;  %2929 = vmatprep.subr.bf16.mxu1 %v3744_v29  ;;  %v3824_v28 = vld [vmem:[#allocation10 + $0x3e8] ss:$16 sps:$4 sm:$0xff]   ;;  %v1922_v10 = vld [vmem:[%s4200_s9] sm:$0xf] }
 0x37d   :  { %v1532_v29 = vmul.f32 0.2, %v2986_v26  ;;  %vm1528_vm12 = vcmp.ge.f32.partialorder %v2986_v26, 0.0 }
 0x37f   :  { %2803 = vmatpush1.bf16.msra.mxu0 %v3743_v30  ;;  %2931 = vmatpush1.bf16.msra.mxu1 %v3746_v31  ;;  %v1536_v5 = vsel %vm1528_vm12, %v2986_v26, %v1532_v29  ;;  %v2240_v30 = vld [vmem:[%s4201_s10] sm:$0xf] }
 0x380   :  { %2805 = vmatprep.subr.bf16.mxu0 %v3747_v32  ;;  %2933 = vmatprep.subr.bf16.mxu1 %v3750_v35  ;;  %v2241_v31 = vunpack.c.l.bf16 %v2240_v30  ;;  %v1927_v32 = vrot.slane %v1922_v10, %v4131_v34  ;;  %v1935_v35 = vrot.slane %v1922_v10, %v4140_v37 }
 0x383   :  { %2807 = vmatpush1.bf16.msra.mxu0 %v3749_v39  ;;  %2935 = vmatpush1.bf16.msra.mxu1 %v3752_v11  ;;  %v2253_v39 = vsub.s32 4, %v4128_v33  ;;  %v2257_v11 = vsub.s32 6, %v4128_v33 }
 0x384   :  { %2809 = vmatprep.subr.bf16.mxu0 %v3753_v40  ;;  %2937 = vmatprep.subr.bf16.mxu1 %v3756_v41  ;;  %v2246_v40 = vrot.slane %v2241_v31, %v4131_v34  ;;  %v1931_v41 = vrot.slane %v1922_v10, %v4137_v36 }
 0x387   :  { %2811 = vmatpush1.bf16.msra.mxu0 %v3755_v42  ;;  %2939 = vmatpush1.bf16.msra.mxu1 %v3758_v43  ;;  %v2250_v42 = vrot.slane %v2241_v31, %v4140_v37  ;;  %v1939_v43 = vrot.slane %v1922_v10, %v4143_v38 }
 0x388   :  { %2813 = vmatprep.subr.bf16.mxu0 %v3759_v44  ;;  %2941 = vmatprep.subr.bf16.mxu1 %v3762_v45 }
 0x389   :  { %v2270_v33 = vrot.slane %v2250_v42, %v4131_v34 }
 0x38b   :  { %2815 = vmatpush1.bf16.msra.mxu0 %v3761_v46  ;;  %2943 = vmatpush1.bf16.msra.mxu1 %v3764_v47 }
 0x38c   :  { %2817 = vmatprep.subr.bf16.mxu0 %v3765_v49  ;;  %2945 = vmatprep.subr.bf16.mxu1 %v3768_v50 }
 0x38f   :  { %2819 = vmatpush1.bf16.msra.mxu0 %v3767_v51  ;;  %2947 = vmatpush1.bf16.msra.mxu1 %v3770_v52  ;;  %v2254_v51 = vrot.slane %v2241_v31, %v2253_v39  ;;  %v2258_v52 = vrot.slane %v2241_v31, %v2257_v11 }
 0x390   :  { %2821 = vmatprep.subr.bf16.mxu0 %v3771_v53  ;;  %2949 = vmatprep.subr.bf16.mxu1 %v3774_v54  ;;  %v2266_v53 = vrot.slane %v2246_v40, %v4131_v34 }
 0x393   :  { %2823 = vmatpush1.bf16.msra.mxu0 %v3773_v55  ;;  %2951 = vmatpush1.bf16.msra.mxu1 %v3776_v56 }
 0x394   :  { %2825 = vmatprep.subr.bf16.mxu0 %v3777_v57  ;;  %2953 = vmatprep.subr.bf16.mxu1 %v3780_v58  ;;  %v2274_v58 = vrot.slane %v2254_v51, %v4131_v34 }
 0x397   :  { %2827 = vmatpush1.bf16.msra.mxu0 %v3779_v59  ;;  %2955 = vmatpush1.bf16.msra.mxu1 %v3782_v60 }
 0x398   :  { %2829 = vmatprep.subr.bf16.mxu0 %v3783_v61  ;;  %2957 = vmatprep.subr.bf16.mxu1 %v3786_v62 }
 0x39b   :  { %2831 = vmatpush1.bf16.msra.mxu0 %v3785_v63  ;;  %2959 = vmatpush1.bf16.msra.mxu1 %v3788_v0  ;;  %v2278_v63 = vrot.slane %v2258_v52, %v4131_v34 }
 0x39c   :  { %2833 = vmatprep.subr.bf16.mxu0 %v3789_v1  ;;  %2961 = vmatprep.subr.bf16.mxu1 %v3792_v2 }
 0x39f   :  { %2835 = vmatpush1.bf16.msra.mxu0 %v3791_v3  ;;  %2963 = vmatpush1.bf16.msra.mxu1 %v3794_v4 }
 0x3a0   :  { %2837 = vmatprep.subr.bf16.mxu0 %v3795_v6  ;;  %2965 = vmatprep.subr.bf16.mxu1 %v3798_v7  ;;  %v2319_v7 = vld [vmem:[#allocation2] ss:$0 sm:$0xff] }
 0x3a3   :  { %2839 = vmatpush1.bf16.msra.mxu0 %v3797_v8  ;;  %2967 = vmatpush1.bf16.msra.mxu1 %v3800_v9 }
 0x3a4   :  { %2841 = vmatprep.subr.bf16.mxu0 %v3801_v12  ;;  %2969 = vmatprep.subr.bf16.mxu1 %v3804_v48 }
 0x3a7   :  { %2843 = vmatpush1.bf16.msra.mxu0 %v3803_v13  ;;  %2971 = vmatpush1.bf16.msra.mxu1 %v3806_v14 }
 0x3a8   :  { %2845 = vmatprep.subr.bf16.mxu0 %v3807_v15  ;;  %2973 = vmatprep.subr.bf16.mxu1 %v3810_v16 }
 0x3ab   :  { %2847 = vmatpush1.bf16.msra.mxu0 %v3809_v17  ;;  %2975 = vmatpush1.bf16.msra.mxu1 %v3812_v18 }
 0x3ac   :  { %2849 = vmatprep.subr.bf16.mxu0 %v3813_v19  ;;  %2977 = vmatprep.subr.bf16.mxu1 %v3816_v20 }
 0x3af   :  { %2851 = vmatpush1.bf16.msra.mxu0 %v3815_v22  ;;  %2979 = vmatpush1.bf16.msra.mxu1 %v3818_v23 }
 0x3b0   :  { %2853 = vmatprep.subr.bf16.mxu0 %v3819_v24  ;;  %2981 = vmatprep.subr.bf16.mxu1 %v3822_v25 }
 0x3b3   :  { %2855 = vmatpush1.bf16.msra.mxu0 %v3821_v27  ;;  %2983 = vmatpush1.bf16.msra.mxu1 %v3824_v28 }
 0x3b6   :  { %2080 = vmatmul.mubr.f32.vlgmr.msra.gmra.mrb[8].mxu0 %v1536_v5  ;;  %2222 = vmatmul.mubr.f32.vlgmr.msra.gmra.mrb[8].mxu1 %v1536_v5 }
 0x489   :  { %v2081_v44 = vpop.f32.mrb[8].mxu0  ;;  %v2223_v45 = vpop.f32.mrb[8].mxu1 }
 0x48a   :  { %v2988_v46 = vadd.f32 %v2081_v44, %v1927_v32  ;;  %v2990_v47 = vadd.f32 %v2223_v45, %v1935_v35  ;;  %v2083_v49 = vpop.f32.mrb[9].mxu0  ;;  %v2225_v50 = vpop.f32.mrb[9].mxu1 }
 0x48b   :  { %v2989_v54 = vadd.f32 %v2083_v49, %v1931_v41  ;;  %v2991_v55 = vadd.f32 %v2225_v50, %v1939_v43 }
 0x48c   :  { %vm2228_vm13 = vcmp.ge.f32.partialorder %v2988_v46, 0.0  ;;  %v2232_v36 = vmul.f32 0.2, %v2988_v46  ;;  %vm2230_vm14 = vcmp.ge.f32.partialorder %v2990_v47, 0.0  ;;  %v2234_v37 = vmul.f32 0.2, %v2990_v47 }
 0x48d   :  { %vm2229_vm15 = vcmp.ge.f32.partialorder %v2989_v54, 0.0  ;;  %v2233_v38 = vmul.f32 0.2, %v2989_v54  ;;  %v2235_v56 = vmul.f32 0.2, %v2991_v55  ;;  %vm2231_vm0 = vcmp.ge.f32.partialorder %v2991_v55, 0.0 }
 0x48e   :  { %v2236_v57 = vsel %vm2228_vm13, %v2988_v46, %v2232_v36  ;;  %v2238_v60 = vsel %vm2230_vm14, %v2990_v47, %v2234_v37 }
 0x48f   :  { %v2279_v59 = vmul.f32 %v2266_v53, %v2236_v57  ;;  %v2237_v61 = vsel %vm2229_vm15, %v2989_v54, %v2233_v38  ;;  %v2239_v0 = vsel %vm2231_vm0, %v2991_v55, %v2235_v56  ;;  %v2281_v1 = vmul.f32 %v2274_v58, %v2238_v60 }
 0x490   :  { %v2280_v62 = vmul.f32 %v2270_v33, %v2237_v61  ;;  %v2282_v3 = vmul.f32 %v2278_v63, %v2239_v0 }
 0x492   :  { %v2283_v2 = vadd.f32 %v2280_v62, %v2279_v59 }
 0x494   :  { %v2284_v4 = vadd.f32 %v2283_v2, %v2281_v1 }
 0x496   :  { %v2285_v6 = vadd.f32 %v2284_v4, %v2282_v3 }
 0x498   :  { %2286 = vadd.xlane.f32.xlu0 %v2285_v6 }
 0x525   :  { %v2287_v8 = vpop.xlane.xlu0 %2286 }
 0x526   :  { %v2295_v9 = vadd.f32 %v2319_v7, %v2287_v8 }
 0x528   :  { %2297 = vst.msk [vmem:[%s4203_s12] sm:$0xff] %vm2296_vm1, %v2295_v9 }
 0x529   :  { %2302 = vsyncpa [#allocation4], 1 }
 0x52a   :  { %2303 = vsyncpa [#allocation6], 1 }
 0x52b   :  { %2304 = vsyncpa [#allocation9], 1 }

</bundles_post_ra>
